<compile_context>
chip_gen: v5e
topology: v5e:2x2
jax: 0.10.0
libtpu: 0.0.40
codegen_flags: <defaults>
</compile_context>

<pallas_src>
import functools

import numpy as np
import jax
import jax.numpy as jnp
from jax.experimental import pallas as pl
from jax.experimental.pallas import tpu as pltpu


# ---------------------------------------------------------------------------
# helpers
# ---------------------------------------------------------------------------
def _round_up(x, m):
    return (x + m - 1) // m * m


def _pick_tile(dim, cap):
    """Largest multiple of 128 that divides `dim` (a multiple of 128), <= cap."""
    t = min(cap, dim)
    t -= t % 128
    while t > 128 and dim % t != 0:
        t -= 128
    return max(t, 128)


# ---------------------------------------------------------------------------
# Pallas kernels: tiled matmul + fused BN epilogue (+residual, +ReLU)
# ---------------------------------------------------------------------------
def _mm_kernel(x_ref, w_ref, s_ref, b_ref, o_ref, acc_ref, *, relu):
    @pl.when(pl.program_id(2) == 0)
    def _():
        acc_ref[...] = jnp.zeros_like(acc_ref)

    acc_ref[...] += jnp.dot(x_ref[...], w_ref[...],
                            preferred_element_type=jnp.float32)

    @pl.when(pl.program_id(2) == pl.num_programs(2) - 1)
    def _():
        y = acc_ref[...] * s_ref[...] + b_ref[...]
        if relu:
            y = jnp.maximum(y, 0.0)
        o_ref[...] = y.astype(o_ref.dtype)


def _mm_res_kernel(x_ref, w_ref, s_ref, b_ref, r_ref, o_ref, acc_ref, *, relu):
    @pl.when(pl.program_id(2) == 0)
    def _():
        acc_ref[...] = jnp.zeros_like(acc_ref)

    acc_ref[...] += jnp.dot(x_ref[...], w_ref[...],
                            preferred_element_type=jnp.float32)

    @pl.when(pl.program_id(2) == pl.num_programs(2) - 1)
    def _():
        y = (acc_ref[...] * s_ref[...] + b_ref[...]
             + r_ref[...].astype(jnp.float32))
        if relu:
            y = jnp.maximum(y, 0.0)
        o_ref[...] = y.astype(o_ref.dtype)


# ---------------------------------------------------------------------------
# Pallas wrapper
# ---------------------------------------------------------------------------
def matmul_bn(x, w, scale, bias, n_out, residual=None, relu=False,
              out_dtype=jnp.bfloat16, group_k=None, group_n=None):
    """y[:, :n_out] = relu?((x @ w) * scale + bias [+ residual]).

    w is pre-padded bf16 (Kp, Np); scale/bias are pre-padded f32 (1, Np).
    If group_k/group_n are given, w is block-diagonal in a group-major layout
    and only the K-tiles feeding the current N-tile are visited.
    """
    M, K = x.shape
    Kp, Np = w.shape
    assert Kp >= K and Kp % 128 == 0 and Np % 128 == 0

    tm = min(512, _round_up(M, 8))
    Mp = _round_up(M, tm)

    if group_k is not None:
        # grouped conv: 128-wide N tiles, contiguous group-major K slab per tile
        tn = 128
        assert tn % group_n == 0 and Kp == K
        kpn = group_k * (tn // group_n)          # K rows feeding one N tile
        assert kpn % 128 == 0
        tk = _pick_tile(kpn, 2048)
        ksteps = kpn // tk
        x_map = lambda i, j, k: (i, j * ksteps + k)
        w_map = lambda i, j, k: (j * ksteps + k, j)
    else:
        tn = _pick_tile(Np, 512)
        tk = _pick_tile(Kp, 1024)
        ksteps = Kp // tk
        x_map = lambda i, j, k: (i, k)
        w_map = lambda i, j, k: (k, j)

    # expose >=2 parallel blocks when cheap (v7x has two TensorCores)
    while (Mp // tm) * (Np // tn) < 2:
        if group_k is None and tn >= 256:
            tn //= 2
        elif tm >= 256 and tm % 32 == 0:
            tm //= 2
        else:
            break

    xp = x.astype(jnp.bfloat16)
    if (Mp, Kp) != (M, K):
        xp = jnp.pad(xp, ((0, Mp - M), (0, Kp - K)))

    args = [xp, w, scale, bias]
    in_specs = [
        pl.BlockSpec((tm, tk), x_map),
        pl.BlockSpec((tk, tn), w_map),
        pl.BlockSpec((1, tn), lambda i, j, k: (0, j)),
        pl.BlockSpec((1, tn), lambda i, j, k: (0, j)),
    ]
    if residual is not None:
        rp = residual.astype(jnp.bfloat16)
        if rp.shape != (Mp, Np):
            rp = jnp.pad(rp, ((0, Mp - rp.shape[0]), (0, Np - rp.shape[1])))
        args.append(rp)
        in_specs.append(pl.BlockSpec((tm, tn), lambda i, j, k: (i, j)))
        kernel = functools.partial(_mm_res_kernel, relu=relu)
    else:
        kernel = functools.partial(_mm_kernel, relu=relu)

    out = pl.pallas_call(
        kernel,
        out_shape=jax.ShapeDtypeStruct((Mp, Np), out_dtype),
        grid=(Mp // tm, Np // tn, ksteps),
        in_specs=in_specs,
        out_specs=pl.BlockSpec((tm, tn), lambda i, j, k: (i, j)),
        scratch_shapes=[pltpu.VMEM((tm, tn), jnp.float32)],
        compiler_params=pltpu.CompilerParams(
            dimension_semantics=("parallel", "parallel", "arbitrary")),
    )(*args)
    return out[:M, :n_out]


# ---------------------------------------------------------------------------
# conv / pool glue
# ---------------------------------------------------------------------------
def im2col(x, kh, kw, stride, pad):
    """x: (B, H, W, C) -> (B*Ho*Wo, kh*kw*C) patches (row order: dy, dx, c)."""
    B, H, W, C = x.shape
    Ho = (H + 2 * pad - kh) // stride + 1
    Wo = (W + 2 * pad - kw) // stride + 1
    xp = jnp.pad(x, ((0, 0), (pad, pad), (pad, pad), (0, 0)))
    cols = []
    for dy in range(kh):
        for dx in range(kw):
            cols.append(xp[:, dy:dy + stride * Ho:stride,
                           dx:dx + stride * Wo:stride, :])
    patches = jnp.concatenate(cols, axis=-1)
    return patches.reshape(B * Ho * Wo, kh * kw * C), Ho, Wo


def conv_bn(x, cp, k, stride, pad, relu=True, residual=None):
    """Conv2d (+grouped via block-diag weight) + folded BN + residual/ReLU."""
    B = x.shape[0]
    cols, Ho, Wo = im2col(x, k, k, stride, pad)
    G = cp['groups']
    if G > 1:
        C = x.shape[-1]
        cpg = C // G
        # reorder K to (group, tap, c_in_group) to match the weight layout
        cols = (cols.reshape(-1, k * k, G, cpg)
                    .transpose(0, 2, 1, 3)
                    .reshape(-1, k * k * C))
        gk, gn = cp['kdim'] // G, cp['n'] // G
    else:
        gk = gn = None
    res = None
    if residual is not None:
        res = residual.reshape(B * Ho * Wo, residual.shape[-1])
    y = matmul_bn(cols, cp['w'], cp['s'], cp['b'], cp['n'],
                  residual=res, relu=relu, group_k=gk, group_n=gn)
    return y.reshape(B, Ho, Wo, cp['n'])


def maxpool_3x3_s2(x):
    """MaxPool2d(3, stride=2, padding=1), NHWC, as a fused elementwise max tree."""
    B, H, W, C = x.shape
    Ho = (H + 2 - 3) // 2 + 1
    Wo = (W + 2 - 3) // 2 + 1
    xp = jnp.pad(x, ((0, 0), (1, 1), (1, 1), (0, 0)),
                 constant_values=-jnp.inf)
    out = None
    for dy in range(3):
        for dx in range(3):
            v = xp[:, dy:dy + 2 * Ho:2, dx:dx + 2 * Wo:2, :]
            out = v if out is None else jnp.maximum(out, v)
    return out


def _adaptive_pool_matrix(Hin, Win, Hout, Wout):
    """Sparse averaging matrix (Hout*Wout, Hin*Win) matching AdaptiveAvgPool2d."""
    W = np.zeros((Hout * Wout, Hin * Win), np.float32)
    for oy in range(Hout):
        sy = (oy * Hin) // Hout
        ey = -(-((oy + 1) * Hin) // Hout)
        for ox in range(Wout):
            sx = (ox * Win) // Wout
            ex = -(-((ox + 1) * Win) // Wout)
            cnt = (ey - sy) * (ex - sx)
            for iy in range(sy, ey):
                for ix in range(sx, ex):
                    W[oy * Wout + ox, iy * Win + ix] = 1.0 / cnt
    return jnp.asarray(W)


def adaptive_avg_pool_7x7_flatten(x):
    """AdaptiveAvgPool2d((7,7)) + NCHW-order flatten (tiny: plain einsum)."""
    B, H, W, C = x.shape
    Wmat = _adaptive_pool_matrix(H, W, 7, 7)                    # (49, H*W)
    xf = x.reshape(B, H * W, C).astype(jnp.float32)
    pooled = jnp.einsum('pq,bqc->bcp', Wmat, xf)                # (B, C, 49)
    return pooled.reshape(B, C * 49).astype(jnp.bfloat16)       # channel-major


# ---------------------------------------------------------------------------
# Model forward
# ---------------------------------------------------------------------------
def bottleneck_fwd(x, p):
    identity = x
    out = conv_bn(x, p['c1'], 1, 1, 0, relu=True)
    out = conv_bn(out, p['c2'], 3, p['stride'], 1, relu=True)
    if p['down'] is not None:
        identity = conv_bn(x, p['down'], 1, p['stride'], 0, relu=False)
    out = conv_bn(out, p['c3'], 1, 1, 0, relu=True, residual=identity)
    return out


def shabby_forward(params, x_nchw):
    x = jnp.transpose(x_nchw, (0, 2, 3, 1)).astype(jnp.bfloat16)   # NCHW -> NHWC
    x = conv_bn(x, params['conv1'], 7, 2, 3, relu=True)
    x = maxpool_3x3_s2(x)
    for blk in params['layer1']:
        x = bottleneck_fwd(x, blk)
    for blk in params['layer2']:
        x = bottleneck_fwd(x, blk)
    for blk in params['layer3']:
        x = bottleneck_fwd(x, blk)
    feat = adaptive_avg_pool_7x7_flatten(x)                        # (B, 1024*49)

    hp = params['heads']
    # fused first Linear (+BN+ReLU, Dropout=identity in eval) of BOTH heads
    y = matmul_bn(feat, hp['w1'], hp['s1'], hp['b1'], hp['n1'],
                  relu=True, out_dtype=jnp.bfloat16)               # (B, 1024)
    # fused block-diagonal second Linear of both heads
    out = matmul_bn(y, hp['w2'], hp['s2'], hp['b2'], hp['n2'],
                    relu=False, out_dtype=jnp.float32)             # (B, nc+4)
    class_logits = out[:, :hp['nc']]
    bbox = out[:, hp['nc']:]
    return class_logits, bbox


# ---------------------------------------------------------------------------
# Deterministic synthetic parameters (ResNeXt50_32x4d shapes), pre-padded bf16
# ---------------------------------------------------------------------------
def init_params(key, num_classes):
    keys = iter(jax.random.split(key, 512))

    def nk():
        return next(keys)

    def make_bn(c):
        gamma = 1.0 + 0.1 * jax.random.normal(nk(), (c,), jnp.float32)
        beta = 0.1 * jax.random.normal(nk(), (c,), jnp.float32)
        mean = 0.1 * jax.random.normal(nk(), (c,), jnp.float32)
        var = jnp.ones((c,), jnp.float32)
        scale = gamma / jnp.sqrt(var + 1e-5)
        bias = beta - mean * scale
        return scale, bias

    def make_conv_bn(k, cin, cout, groups=1):
        K = k * k * cin
        fan_in = k * k * (cin // groups)
        w = jax.random.normal(nk(), (K, cout), jnp.float32) * np.sqrt(2.0 / fan_in)
        if groups > 1:
            # block-diagonal weight in (group, tap, cg_in) x (group, cg_out) layout
            gi = np.arange(K) // (k * k * (cin // groups))
            go = np.arange(cout) // (cout // groups)
            w = w * jnp.asarray((gi[:, None] == go[None, :]).astype(np.float32))
        Kp, Np = _round_up(K, 128), _round_up(cout, 128)
        w = jnp.pad(w, ((0, Kp - K), (0, Np - cout))).astype(jnp.bfloat16)
        s, b = make_bn(cout)
        s = jnp.pad(s, (0, Np - cout)).reshape(1, Np)
        b = jnp.pad(b, (0, Np - cout)).reshape(1, Np)
        return {'w': w, 's': s, 'b': b, 'n': cout, 'kdim': K, 'groups': groups}

    def make_block(cin, width, cout, stride):
        return {
            'c1': make_conv_bn(1, cin, width),
            'c2': make_conv_bn(3, width, width, groups=32),
            'c3': make_conv_bn(1, width, cout),
            'down': (make_conv_bn(1, cin, cout)
                     if (stride != 1 or cin != cout) else None),
            'stride': stride,
        }

    def make_layer(cin, planes, blocks, stride):
        width = planes * 2          # groups=32, width_per_group=4
        cout = planes * 4
        layer = [make_block(cin, width, cout, stride)]
        for _ in range(blocks - 1):
            layer.append(make_block(cout, width, cout, 1))
        return layer, cout

    params = {}
    params['conv1'] = make_conv_bn(7, 3, 64)
    c = 64
    params['layer1'], c = make_layer(c, 64, 3, 1)     # -> 256
    params['layer2'], c = make_layer(c, 128, 4, 2)    # -> 512
    params['layer3'], c = make_layer(c, 256, 6, 2)    # -> 1024
    feat_dim = c * 7 * 7                              # 1024 * 49 = 50176

    def make_head_parts(out_dim):
        w1 = jax.random.normal(nk(), (feat_dim, 512), jnp.float32) * np.sqrt(2.0 / feat_dim)
        b1_lin = 0.01 * jax.random.normal(nk(), (512,), jnp.float32)
        s_bn, b_bn = make_bn(512)
        w2 = jax.random.normal(nk(), (512, out_dim), jnp.float32) * np.sqrt(1.0 / 512)
        b2 = 0.01 * jax.random.normal(nk(), (out_dim,), jnp.float32)
        # fold the linear bias into the BN epilogue: (x@W + b)*s + beta
        return w1, b1_lin * s_bn + b_bn, s_bn, w2, b2

    w1c, b1c, s1c, w2c, b2c = make_head_parts(num_classes)
    w1l, b1l, s1l, w2l, b2l = make_head_parts(4)

    # fuse the two heads' first Linears along N: (50176, 1024)
    w1 = jnp.concatenate([w1c, w1l], axis=1).astype(jnp.bfloat16)
    s1 = jnp.concatenate([s1c, s1l]).reshape(1, 1024)
    b1 = jnp.concatenate([b1c, b1l]).reshape(1, 1024)

    # fuse the second Linears as a block-diagonal (1024, nc+4) matmul, padded to 128
    n2 = num_classes + 4
    Np2 = _round_up(n2, 128)
    w2 = jnp.zeros((1024, Np2), jnp.float32)
    w2 = w2.at[:512, :num_classes].set(w2c)
    w2 = w2.at[512:, num_classes:n2].set(w2l)
    b2 = jnp.zeros((Np2,), jnp.float32)
    b2 = b2.at[:num_classes].set(b2c).at[num_classes:n2].set(b2l)

    params['heads'] = {
        'w1': w1, 's1': s1, 'b1': b1, 'n1': 1024,
        'w2': w2.astype(jnp.bfloat16),
        's2': jnp.ones((1, Np2), jnp.float32),
        'b2': b2.reshape(1, Np2),
        'n2': n2, 'nc': num_classes,
    }
    return params


# ---------------------------------------------------------------------------
if __name__ == "__main__":
    num_classes = 10
    key = jax.random.PRNGKey(0)
    k_in, k_par = jax.random.split(key)

    # PyTorch-style NCHW input (spatial 64 -> 32 -> 16 -> 8 -> 4)
    x = jax.random.normal(k_in, (2, 3, 64, 64), jnp.float32)
    params = init_params(k_par, num_classes)

    class_logits, bbox = shabby_forward(params, x)
    jax.block_until_ready((class_logits, bbox))

    assert class_logits.shape == (2, num_classes), class_logits.shape
    assert bbox.shape == (2, 4), bbox.shape
    assert bool(jnp.all(jnp.isfinite(class_logits))) and bool(jnp.all(jnp.isfinite(bbox)))
    print("KERNEL_OK")
</pallas_src>

<mosaic_0001>
module attributes {stable_mosaic.version = 11 : i64} {
  func.func @_mm_kernel(%arg0: i32, %arg1: i32, %arg2: i32, %arg3: memref<512x256xbf16, #tpu.memory_space<vmem>>, %arg4: memref<256x128xbf16, #tpu.memory_space<vmem>>, %arg5: memref<1x128xf32, #tpu.memory_space<vmem>>, %arg6: memref<1x128xf32, #tpu.memory_space<vmem>>, %arg7: memref<512x128xbf16, #tpu.memory_space<vmem>>, %arg8: memref<512x128xf32, #tpu.memory_space<vmem>>) attributes {dimension_semantics = [#tpu.dimension_semantics<parallel>, #tpu.dimension_semantics<parallel>, #tpu.dimension_semantics<arbitrary>], iteration_bounds = array<i64: 4, 1, 1>, scalar_prefetch = 0 : i64, scratch_operands = 1 : i64, tpu.core_type = #tpu.core_type<tc>, window_params = [{transform_indices = @transform_0, window_bounds = array<i64: 512, 256>}, {transform_indices = @transform_1, window_bounds = array<i64: 256, 128>}, {transform_indices = @transform_2, window_bounds = array<i64: 1, 128>}, {transform_indices = @transform_3, window_bounds = array<i64: 1, 128>}, {transform_indices = @transform_4, window_bounds = array<i64: 512, 128>}]} {
    %c0_i32 = arith.constant 0 : i32
    %0 = arith.cmpi eq, %arg2, %c0_i32 : i32
    %1 = arith.extui %0 : i1 to i32
    %c0_i32_0 = arith.constant 0 : i32
    %2 = arith.cmpi ne, %1, %c0_i32_0 : i32
    scf.if %2 {
      %cst_10 = arith.constant 0.000000e+00 : f32
      %12 = vector.broadcast %cst_10 : f32 to vector<512x128xf32>
      %c0_11 = arith.constant 0 : index
      %c0_12 = arith.constant 0 : index
      %13 = vector.load %arg8[%c0_11, %c0_12] : memref<512x128xf32, #tpu.memory_space<vmem>>, vector<512x128xf32>
      tpu.vector_store %arg8[%c0_11, %c0_12], %12 {strides = array<i32>} : memref<512x128xf32, #tpu.memory_space<vmem>>, vector<512x128xf32>,
    } else {
    }
    %c0 = arith.constant 0 : index
    %c0_1 = arith.constant 0 : index
    %3 = vector.load %arg8[%c0, %c0_1] : memref<512x128xf32, #tpu.memory_space<vmem>>, vector<512x128xf32>
    %c0_2 = arith.constant 0 : index
    %c0_3 = arith.constant 0 : index
    %4 = vector.load %arg3[%c0_2, %c0_3] : memref<512x256xbf16, #tpu.memory_space<vmem>>, vector<512x256xbf16>
    %c0_4 = arith.constant 0 : index
    %c0_5 = arith.constant 0 : index
    %5 = vector.load %arg4[%c0_4, %c0_5] : memref<256x128xbf16, #tpu.memory_space<vmem>>, vector<256x128xbf16>
    %cst = arith.constant dense<0.000000e+00> : vector<512x128xf32>
    %6 = tpu.matmul %4, %5, %cst {dimension_numbers = #tpu.dot_dimension_numbers<[1], [0], [0], [1], [0, 0, 1, 1], [], []>} : vector<512x256xbf16>, vector<256x128xbf16>, vector<512x128xf32> -> vector<512x128xf32>
    %7 = arith.addf %3, %6 : vector<512x128xf32>
    %c0_6 = arith.constant 0 : index
    %c0_7 = arith.constant 0 : index
    %8 = vector.load %arg8[%c0_6, %c0_7] : memref<512x128xf32, #tpu.memory_space<vmem>>, vector<512x128xf32>
    tpu.vector_store %arg8[%c0_6, %c0_7], %7 {strides = array<i32>} : memref<512x128xf32, #tpu.memory_space<vmem>>, vector<512x128xf32>,
    %c0_i32_8 = arith.constant 0 : i32
    %9 = arith.cmpi eq, %arg2, %c0_i32_8 : i32
    %10 = arith.extui %9 : i1 to i32
    %c0_i32_9 = arith.constant 0 : i32
    %11 = arith.cmpi ne, %10, %c0_i32_9 : i32
    scf.if %11 {
      %c0_10 = arith.constant 0 : index
      %c0_11 = arith.constant 0 : index
      %12 = vector.load %arg8[%c0_10, %c0_11] : memref<512x128xf32, #tpu.memory_space<vmem>>, vector<512x128xf32>
      %c0_12 = arith.constant 0 : index
      %c0_13 = arith.constant 0 : index
      %13 = vector.load %arg5[%c0_12, %c0_13] : memref<1x128xf32, #tpu.memory_space<vmem>>, vector<1x128xf32>
      %14 = vector.broadcast %13 : vector<1x128xf32> to vector<512x128xf32>
      %15 = arith.mulf %12, %14 : vector<512x128xf32>
      %c0_14 = arith.constant 0 : index
      %c0_15 = arith.constant 0 : index
      %16 = vector.load %arg6[%c0_14, %c0_15] : memref<1x128xf32, #tpu.memory_space<vmem>>, vector<1x128xf32>
      %17 = vector.broadcast %16 : vector<1x128xf32> to vector<512x128xf32>
      %18 = arith.addf %15, %17 : vector<512x128xf32>
      %cst_16 = arith.constant 0.000000e+00 : f32
      %19 = vector.broadcast %cst_16 : f32 to vector<512x128xf32>
      %20 = arith.maximumf %18, %19 : vector<512x128xf32>
      %21 = arith.truncf %20 : vector<512x128xf32> to vector<512x128xbf16>
      %c0_17 = arith.constant 0 : index
      %c0_18 = arith.constant 0 : index
      %22 = vector.load %arg7[%c0_17, %c0_18] : memref<512x128xbf16, #tpu.memory_space<vmem>>, vector<512x128xbf16>
      tpu.vector_store %arg7[%c0_17, %c0_18], %21 {strides = array<i32>} : memref<512x128xbf16, #tpu.memory_space<vmem>>, vector<512x128xbf16>,
    } else {
    }
    return
  }
  func.func @transform_0(%arg0: i32, %arg1: i32, %arg2: i32) -> (i32, i32) {
    %c0_i32 = arith.constant 0 : i32
    return %arg0, %arg2 : i32, i32
  }
  func.func @transform_1(%arg0: i32, %arg1: i32, %arg2: i32) -> (i32, i32) {
    %c0_i32 = arith.constant 0 : i32
    return %arg2, %arg1 : i32, i32
  }
  func.func @transform_2(%arg0: i32, %arg1: i32, %arg2: i32) -> (i32, i32) {
    %c0_i32 = arith.constant 0 : i32
    %c0_i32_0 = arith.constant 0 : i32
    return %c0_i32, %arg1 : i32, i32
  }
  func.func @transform_3(%arg0: i32, %arg1: i32, %arg2: i32) -> (i32, i32) {
    %c0_i32 = arith.constant 0 : i32
    %c0_i32_0 = arith.constant 0 : i32
    return %c0_i32, %arg1 : i32, i32
  }
  func.func @transform_4(%arg0: i32, %arg1: i32, %arg2: i32) -> (i32, i32) {
    %c0_i32 = arith.constant 0 : i32
    return %arg0, %arg1 : i32, i32
  }
}

</mosaic_0001>

<bundles_post_ra>
// kernel: tpu_custom_call.1
= control target key start
LH: loop header
LB: loop body
LE: loop exit
PB: predicated region body
PF: predicated region fallthrough
CT: control target
= control target key end

     0   :  { %s3289_s0 = inlined_call_operand.hbm [shape: bf16[2048,256], index: 0, kind: input, shape index: {}]   ;;  %s3290_s1 = inlined_call_operand.hbm [shape: bf16[256,128], index: 1, kind: input, shape index: {}]   ;;  %s3291_s2 = inlined_call_operand.vmem [shape: f32[1,128], index: 2, kind: input, shape index: {}]   ;;  %s3292_s3 = inlined_call_operand.vmem [shape: f32[1,128], index: 3, kind: input, shape index: {}]   ;;  %s3293_s4 = inlined_call_operand.hbm [shape: bf16[2048,128], index: 4, kind: output, shape index: {}]  }
   0x1   :  { %3295 = sst [smem:[#allocation13_spill]] %s3290_s1 }
   0x2   :  { %9 = vsyncpa [#allocation4], 0 }
   0x3   :  { %11 = vsyncpa [#allocation4 + $0x1], 0 }
   0x4   :  { %12 = vsyncpa [#allocation7], 0 }
   0x5   :  { %13 = vsyncpa [#allocation5], 0 }
   0x6   :  { %15 = vsyncpa [#allocation5 + $0x1], 0  ;;  %s2846_s15 = smov 0   ;;  %s2848_s16 = smov 0  }
   0x7   :  { %s2850_s17 = smov 0   ;;  %s2852_s18 = smov 0  }
   0x8   :  { %s2854_s19 = smov 0   ;;  %s2856_s20 = smov 0  }
   0x9 LB: > { %s1953_s21 = sadd.s32 4294967295, %s2812_s20   ;;  %s1954_s22 = sadd.s32 4294967294, %s2812_s20   ;;  %s2812_s20 = sphi %s2856_s20, %s21_s20   ;;  %s2808_s19 = sphi %s2854_s19, %s3310_s19   ;;  %s2804_s18 = sphi %s2852_s18, %s3309_s18   ;;  %s2800_s17 = sphi %s2850_s17, %s3308_s17   ;;  %s2796_s16 = sphi %s2848_s16, %s3307_s16   ;;  %s2792_s15 = sphi %s2846_s15, %s3306_s15  }
   0xa   : > { %p62_p0 = scmp.ne.s32.totalorder %s2796_s16, %s2792_s15  ;;  %p2880_p1 = scmp.eq.s32.totalorder %s1953_s21, 0 }
   0xb   : > { %p2884_p2 = scmp.eq.s32.totalorder %s1953_s21, 3  ;;  %p174_p3 = scmp.eq.s32.totalorder %s1954_s22, 3 }
   0xc   : > { %p2890_p4 = por %p2880_p1, %p62_p0  ;;  %p1955_p5 = scmp.ge.s32.totalorder %s2812_s20, 1 }
   0xd   : > { %p2895_p6 = por %p174_p3, %p62_p0  ;;  %p181_p7 = scmp.lt.s32.totalorder %s2812_s20, 5 }
   0xe   : > { %s3300_s1 = sld [smem:[#allocation13_spill]]  ;;  %s2814_s5 = smov [#allocation6]  }
   0xf   : > { %p2903_p8 = pnand %p1955_p5, %p181_p7  ;;  %s198_s6 = sshll.u32 %s2814_s5, 4  ;;  %s199_s6 = int_to_ptr.vmem [resolvable:$true] %s198_s6 }
  0x10   : > { %s2815_s7 = smov 64   ;;  %s2816_s8 = smov 4  }
  0x11   : > { %p2591_p9 = pneg %p2903_p8  ;;  %s40_s9 = sadd.s32 1, %s2808_s19 }
  0x12   : > { %p42_p11 = scmp.ge.s32.totalorder %s40_s9, 4  ;;  %s49_s10 = sadd.s32 1, %s2800_s17 }
  0x13   : > { %p2592_p10 = pnand %p2591_p9, %p2880_p1  ;;  %p56_p12 = scmp.ne.s32.totalorder %s2800_s17, %s2796_s16 }
  0x14   : > { %s196_s29 = sshll.u32 %s3300_s1, 4  ;;  %p57_p13 = scmp.eq.s32.totalorder %s2812_s20, 0  ;;  %s197_s29 = int_to_ptr.hbm [resolvable:$true] %s196_s29 }
  0x15   : > { %2594 = dma.hbm_to_vmem [thread:$0]  (!%p2592_p10), %s197_s29, 2048, %s199_s6, [#allocation7], %s2815_s7, %s2815_s7, %s2816_s8  }
  0x16   : > { %s3312_s9 = smov (%p42_p11, %s40_s9), 0  ;;  %p2918_p0 = por %p57_p13, %p56_p12 }
  0x17   : > { %3302 = sst [smem:[#allocation12_spill]] %s3312_s9  ;;  %p2924_p3 = por %p2884_p2, %p56_p12 }
  0x18   : > { %s44_s13 = ssub.s32 %s2808_s19, %s3312_s9  ;;  %p2604_p5 = scmp.lt.s32.totalorder %s2812_s20, 4 }
  0x19   : > { %p47_p7 = scmp.eq.s32.totalorder %s44_s13, 0  ;;  %s224_s14 = sand.u32 1, %s2800_s17  }
  0x1a   : > { %s1960_s21 = sshll.u32 %s224_s14, 9  ;;  %s2294_s27 = sshll.u32 %s2808_s19, 9 }
  0x1b   : > { %s2933_s22 = scalar_select %p47_p7, %s2800_s17, %s49_s10  }
  0x1c   : > { %s236_s5 = scalar_lea.hbm %s3289_s0, %s2294_s27  ;;  %s228_s6 = scalar_lea.vmem [#allocation3], %s1960_s21 }
  0x1d   : > { %s239_s7 = sshll.u32 %s228_s6, 4  ;;  %s237_s24 = sshll.u32 %s236_s5, 4  ;;  %s240_s7 = int_to_ptr.vmem [resolvable:$true] %s239_s7  ;;  %s238_s24 = int_to_ptr.hbm [resolvable:$true] %s237_s24 }
  0x1e   : > { %p2596_p2 = pnand %p2604_p5, %p2918_p0  ;;  %s225_s8 = scalar_lea.sflag [#allocation4], %s224_s14 }
  0x1f   : > { %s2817_s1 = smov 128   ;;  %s2818_s9 = smov 8  }
  0x20   : > { %2598 = dma.hbm_to_vmem [thread:$0]  (!%p2596_p2), %s238_s24, 8192, %s240_s7, %s225_s8, %s2817_s1, %s2817_s1, %s2818_s9  }
  0x21   : > { %251 = sbr.rel (%p2903_p8) target bundleno = 468 (0x1d4), region = 36  ;;  %s2944_s10 = sand.u32 (!%p2903_p8), 1, %s2796_s16  }
  0x22   : > { %s1965_s13 = sshll.u32 (!%p2903_p8), %s2944_s10, 9  ;;  %s254_s21 = scalar_lea.sflag (!%p2903_p8), [#allocation4], %s2944_s10 }
  0x23   : > { %s2948_s27 = scalar_lea.vmem (!%p2903_p8), [#allocation3], %s1965_s13 }
  0x26   : > { %2779 = dma.done.wait (%p2890_p4), %s254_s21, 8192  }
  0x27   : > { %2781 = vsyncadd (%p2890_p4), %s254_s21, 4294959104 }
  0x28   : > { %2783 = dma.done.wait (%p2880_p1), [#allocation7], 2048  }
  0x29   : > { %2785 = vsyncadd (%p2880_p1), [#allocation7], 4294965248  ;;  %v2366_v0 = vld [vmem:[#allocation6 + $0x38] sm:$0xff]  ;;  %v2365_v2 = vld [vmem:[#allocation6 + $0x30] sm:$0xff]  ;;  %s1967_s9 = sshll.u32 %s2944_s10, 8  ;;  %s2375_s6 = sshll.u32 %s2804_s18, 8 }
  0x2a   : > { %v2374_v1 = vld [vmem:[#allocation6 + $0x78] sm:$0xff]  ;;  %948 = vmatpush.bf16.msra.mxu0 %v2366_v0  ;;  %2567 = vmatpush.bf16.msra.mxu2 %v2366_v0  ;;  %v2373_v3 = vld [vmem:[#allocation6 + $0x70] sm:$0xff]  ;;  %v2364_v4 = vld [vmem:[#allocation6 + $0x28] sm:$0xff]  ;;  %s3056_s11 = scalar_lea.vmem [#allocation8], %s1967_s9  ;;  %s1822_s8 = scalar_lea.hbm %s3293_s4, %s2375_s6 }
  0x2b   : > { %1117 = vmatpush.bf16.msra.mxu1 %v2374_v1  ;;  %2575 = vmatpush.bf16.msra.mxu3 %v2374_v1  ;;  %v2372_v5 = vld [vmem:[#allocation6 + $0x68] sm:$0xff]  ;;  %v2363_v6 = vld [vmem:[#allocation6 + $0x20] sm:$0xff]  ;;  %v2362_v8 = vld [vmem:[#allocation6 + $0x18] sm:$0xff]  ;;  %s1823_s13 = sshll.u32 %s3056_s11, 4  ;;  %s1825_s21 = sshll.u32 %s1822_s8, 4  ;;  %s1824_s13 = int_to_ptr.vmem [resolvable:$true] %s1823_s13  ;;  %s1826_s21 = int_to_ptr.hbm [resolvable:$true] %s1825_s21 }
  0x2c   : > { %v2371_v7 = vld [vmem:[#allocation6 + $0x60] sm:$0xff]  ;;  %v2370_v9 = vld [vmem:[#allocation6 + $0x58] sm:$0xff]  ;;  %v2361_v10 = vld [vmem:[#allocation6 + $0x10] sm:$0xff]  ;;  %s1810_s18 = scalar_lea.sflag [#allocation5], %s2944_s10  ;;  %s2746_s30 = scalar_lea.hbm %s3293_s4, 1024 }
  0x2d   : > { %v2369_v11 = vld [vmem:[#allocation6 + $0x50] sm:$0xff]  ;;  %v2360_v12 = vld [vmem:[#allocation6 + $0x8] sm:$0xff]  ;;  %v2359_v14 = vld [vmem:[#allocation6] sm:$0xff] }
  0x2e   : > { %949 = vmatpush.bf16.msra.mxu0 %v2365_v2  ;;  %2568 = vmatpush.bf16.msra.mxu2 %v2365_v2  ;;  %v2368_v13 = vld [vmem:[#allocation6 + $0x48] sm:$0xff]  ;;  %v2367_v15 = vld [vmem:[#allocation6 + $0x40] sm:$0xff]  ;;  %v1978_v28 = vld [vmem:[%s2948_s27 + $0x10] sm:$0xf] }
  0x2f   : > { %1118 = vmatpush.bf16.msra.mxu1 %v2373_v3  ;;  %2576 = vmatpush.bf16.msra.mxu3 %v2373_v3  ;;  %v1970_v16 = vld [vmem:[%s2948_s27] sm:$0xf]  ;;  %v2296_v17 = vld [vmem:[%s2948_s27 + $0x4] sm:$0xf0]  ;;  %v2295_v20 = vld [vmem:[%s2948_s27 + $0x4] sm:$0xf] }
  0x30   : > { %v2098_v18 = vld [vmem:[%s2948_s27 + $0x100] sm:$0xf]  ;;  %v2328_v19 = vld [vmem:[%s2948_s27 + $0x104] sm:$0xf0]  ;;  %v1972_v21 = vld [vmem:[%s2948_s27 + $0x8] sm:$0xf0]  ;;  %v1971_v24 = vor.u32 %v2296_v17, %v1970_v16 }
  0x31   : > { %v2327_v22 = vld [vmem:[%s2948_s27 + $0x104] sm:$0xf]  ;;  %v2100_v23 = vld [vmem:[%s2948_s27 + $0x108] sm:$0xf0]  ;;  %v2099_v25 = vor.u32 %v2328_v19, %v2098_v18  ;;  %v1975_v26 = vor.u32 %v2295_v20, %v1972_v21  ;;  %v2298_v29 = vld [vmem:[%s2948_s27 + $0x14] sm:$0xf0] }
  0x32   : > { %950 = vmatpush.bf16.msra.mxu0 %v2364_v4  ;;  %2569 = vmatpush.bf16.msra.mxu2 %v2364_v4  ;;  %v2103_v27 = vor.u32 %v2327_v22, %v2100_v23  ;;  %v2106_v30 = vld [vmem:[%s2948_s27 + $0x110] sm:$0xf]  ;;  %v2330_v31 = vld [vmem:[%s2948_s27 + $0x114] sm:$0xf0]  ;;  %v2297_v32 = vld [vmem:[%s2948_s27 + $0x14] sm:$0xf]  ;;  %v1979_v36 = vor.u32 %v2298_v29, %v1978_v28 }
  0x33   : > { %1119 = vmatpush.bf16.msra.mxu1 %v2372_v5  ;;  %2577 = vmatpush.bf16.msra.mxu3 %v2372_v5  ;;  %v1980_v33 = vld [vmem:[%s2948_s27 + $0x18] sm:$0xf0]  ;;  %v2329_v34 = vld [vmem:[%s2948_s27 + $0x114] sm:$0xf]  ;;  %v2107_v37 = vor.u32 %v2330_v31, %v2106_v30  ;;  %v1986_v40 = vld [vmem:[%s2948_s27 + $0x20] sm:$0xf] }
  0x34   : > { %v2108_v35 = vld [vmem:[%s2948_s27 + $0x118] sm:$0xf0]  ;;  %v1983_v38 = vor.u32 %v2297_v32, %v1980_v33  ;;  %v2300_v41 = vld [vmem:[%s2948_s27 + $0x24] sm:$0xf0]  ;;  %v2114_v42 = vld [vmem:[%s2948_s27 + $0x120] sm:$0xf] }
  0x35   : > { %v2111_v39 = vor.u32 %v2329_v34, %v2108_v35  ;;  %v2332_v43 = vld [vmem:[%s2948_s27 + $0x124] sm:$0xf0]  ;;  %v2299_v44 = vld [vmem:[%s2948_s27 + $0x24] sm:$0xf]  ;;  %v1988_v45 = vld [vmem:[%s2948_s27 + $0x28] sm:$0xf0]  ;;  %v1987_v48 = vor.u32 %v2300_v41, %v1986_v40 }
  0x36   : > { %951 = vmatpush.bf16.msra.mxu0 %v2363_v6  ;;  %2570 = vmatpush.bf16.msra.mxu2 %v2363_v6  ;;  %v2331_v46 = vld [vmem:[%s2948_s27 + $0x124] sm:$0xf]  ;;  %v2116_v47 = vld [vmem:[%s2948_s27 + $0x128] sm:$0xf0]  ;;  %v2115_v49 = vor.u32 %v2332_v43, %v2114_v42  ;;  %v1991_v50 = vor.u32 %v2299_v44, %v1988_v45  ;;  %v1994_v52 = vld [vmem:[%s2948_s27 + $0x30] sm:$0xf] }
  0x37   : > { %1120 = vmatpush.bf16.msra.mxu1 %v2371_v7  ;;  %2578 = vmatpush.bf16.msra.mxu3 %v2371_v7  ;;  %v2119_v51 = vor.u32 %v2331_v46, %v2116_v47  ;;  %v2302_v53 = vld [vmem:[%s2948_s27 + $0x34] sm:$0xf0]  ;;  %v2122_v54 = vld [vmem:[%s2948_s27 + $0x130] sm:$0xf]  ;;  %v2301_v56 = vld [vmem:[%s2948_s27 + $0x34] sm:$0xf] }
  0x38   : > { %v2334_v55 = vld [vmem:[%s2948_s27 + $0x134] sm:$0xf0]  ;;  %v1996_v57 = vld [vmem:[%s2948_s27 + $0x38] sm:$0xf0]  ;;  %v2333_v58 = vld [vmem:[%s2948_s27 + $0x134] sm:$0xf]  ;;  %v1995_v60 = vor.u32 %v2302_v53, %v1994_v52 }
  0x39   : > { %v2124_v59 = vld [vmem:[%s2948_s27 + $0x138] sm:$0xf0]  ;;  %v2123_v61 = vor.u32 %v2334_v55, %v2122_v54  ;;  %v1999_v62 = vor.u32 %v2301_v56, %v1996_v57  ;;  %v2002_v0 = vld [vmem:[%s2948_s27 + $0x40] sm:$0xf]  ;;  %v2304_v1 = vld [vmem:[%s2948_s27 + $0x44] sm:$0xf0] }
  0x3a   : > { %952 = vmatpush.bf16.msra.mxu0 %v2362_v8  ;;  %2571 = vmatpush.bf16.msra.mxu2 %v2362_v8  ;;  %v2127_v63 = vor.u32 %v2333_v58, %v2124_v59  ;;  %v2130_v2 = vld [vmem:[%s2948_s27 + $0x140] sm:$0xf]  ;;  %v2336_v3 = vld [vmem:[%s2948_s27 + $0x144] sm:$0xf0]  ;;  %v2303_v4 = vld [vmem:[%s2948_s27 + $0x44] sm:$0xf]  ;;  %v2003_v8 = vor.u32 %v2304_v1, %v2002_v0 }
  0x3b   : > { %1121 = vmatpush.bf16.msra.mxu1 %v2370_v9  ;;  %2579 = vmatpush.bf16.msra.mxu3 %v2370_v9  ;;  %v2004_v5 = vld [vmem:[%s2948_s27 + $0x48] sm:$0xf0]  ;;  %v2335_v6 = vld [vmem:[%s2948_s27 + $0x144] sm:$0xf]  ;;  %v2131_v9 = vor.u32 %v2336_v3, %v2130_v2  ;;  %v2305_v16 = vld [vmem:[%s2948_s27 + $0x54] sm:$0xf] }
  0x3c   : > { %v2132_v7 = vld [vmem:[%s2948_s27 + $0x148] sm:$0xf0]  ;;  %v2012_v17 = vld [vmem:[%s2948_s27 + $0x58] sm:$0xf0]  ;;  %v2337_v18 = vld [vmem:[%s2948_s27 + $0x154] sm:$0xf] }
  0x3d   : > { %v2140_v19 = vld [vmem:[%s2948_s27 + $0x158] sm:$0xf0]  ;;  %v2015_v22 = vor.u32 %v2305_v16, %v2012_v17  ;;  %v2307_v28 = vld [vmem:[%s2948_s27 + $0x64] sm:$0xf]  ;;  %v2020_v29 = vld [vmem:[%s2948_s27 + $0x68] sm:$0xf0] }
  0x3e   : > { %953 = vmatpush.bf16.msra.mxu0 %v2361_v10  ;;  %2572 = vmatpush.bf16.msra.mxu2 %v2361_v10  ;;  %v2007_v10 = vor.u32 %v2303_v4, %v2004_v5  ;;  %v2143_v23 = vor.u32 %v2337_v18, %v2140_v19  ;;  %v2339_v30 = vld [vmem:[%s2948_s27 + $0x164] sm:$0xf]  ;;  %v2148_v31 = vld [vmem:[%s2948_s27 + $0x168] sm:$0xf0]  ;;  %v2023_v34 = vor.u32 %v2307_v28, %v2020_v29  ;;  %v2309_v40 = vld [vmem:[%s2948_s27 + $0x74] sm:$0xf] }
  0x3f   : > { %1122 = vmatpush.bf16.msra.mxu1 %v2369_v11  ;;  %2580 = vmatpush.bf16.msra.mxu3 %v2369_v11  ;;  %v2135_v11 = vor.u32 %v2335_v6, %v2132_v7  ;;  %v2151_v35 = vor.u32 %v2339_v30, %v2148_v31  ;;  %v2028_v41 = vld [vmem:[%s2948_s27 + $0x78] sm:$0xf0]  ;;  %v2341_v42 = vld [vmem:[%s2948_s27 + $0x174] sm:$0xf]  ;;  %v2311_v52 = vld [vmem:[%s2948_s27 + $0x84] sm:$0xf] }
  0x40   : > { %v2156_v43 = vld [vmem:[%s2948_s27 + $0x178] sm:$0xf0]  ;;  %v2031_v46 = vor.u32 %v2309_v40, %v2028_v41  ;;  %v2036_v53 = vld [vmem:[%s2948_s27 + $0x88] sm:$0xf0]  ;;  %v2343_v54 = vld [vmem:[%s2948_s27 + $0x184] sm:$0xf] }
  0x41   : > { %v2159_v47 = vor.u32 %v2341_v42, %v2156_v43  ;;  %v2164_v55 = vld [vmem:[%s2948_s27 + $0x188] sm:$0xf0]  ;;  %v2039_v59 = vor.u32 %v2311_v52, %v2036_v53  ;;  %v3039_v3 = vld [vmem:[%s3292_s3] ss:$0 sm:$0xff]  ;;  %v2345_v16 = vld [vmem:[%s2948_s27 + $0x194] sm:$0xf] }
  0x42   : > { %954 = vmatpush.bf16.msra.mxu0 %v2360_v12  ;;  %2573 = vmatpush.bf16.msra.mxu2 %v2360_v12  ;;  %v2010_v12 = vld [vmem:[%s2948_s27 + $0x50] sm:$0xf]  ;;  %v2172_v17 = vld [vmem:[%s2948_s27 + $0x198] sm:$0xf0]  ;;  %v2315_v52 = vld [vmem:[%s2948_s27 + $0xa4] sm:$0xf] }
  0x43   : > { %1123 = vmatpush.bf16.msra.mxu1 %v2368_v13  ;;  %2581 = vmatpush.bf16.msra.mxu3 %v2368_v13  ;;  %v2306_v13 = vld [vmem:[%s2948_s27 + $0x54] sm:$0xf0]  ;;  %v2175_v29 = vor.u32 %v2345_v16, %v2172_v17  ;;  %v2052_v53 = vld [vmem:[%s2948_s27 + $0xa8] sm:$0xf0] }
  0x44   : > { %v2011_v20 = vor.u32 %v2306_v13, %v2010_v12  ;;  %v2346_v13 = vld [vmem:[%s2948_s27 + $0x194] sm:$0xf0] }
  0x46   : > { %955 = vmatpush.bf16.msra.mxu0 %v2359_v14  ;;  %2574 = vmatpush.bf16.msra.mxu2 %v2359_v14  ;;  %v2138_v14 = vld [vmem:[%s2948_s27 + $0x150] sm:$0xf] }
  0x47   : > { %1124 = vmatpush.bf16.msra.mxu1 %v2367_v15  ;;  %2582 = vmatpush.bf16.msra.mxu3 %v2367_v15  ;;  %v2338_v15 = vld [vmem:[%s2948_s27 + $0x154] sm:$0xf0] }
  0x48   : > { %v2139_v21 = vor.u32 %v2338_v15, %v2138_v14  ;;  %v2313_v14 = vld [vmem:[%s2948_s27 + $0x94] sm:$0xf]  ;;  %v2044_v15 = vld [vmem:[%s2948_s27 + $0x98] sm:$0xf0] }
  0x49   : > { %956 = vmatmul.bf16.vlgmr.msra.gmra.mxu0 %v1971_v24  ;;  %1036 = vmatmul.bf16.vlgmr.msra.gmra.mxu2 %v2099_v25  ;;  %v2018_v24 = vld [vmem:[%s2948_s27 + $0x60] sm:$0xf]  ;;  %v2308_v25 = vld [vmem:[%s2948_s27 + $0x64] sm:$0xf0] }
  0x4a   : > { %1125 = vmatmul.bf16.vlgmr.msra.gmra.mxu1 %v1975_v26  ;;  %1205 = vmatmul.bf16.vlgmr.msra.gmra.mxu3 %v2103_v27  ;;  %v2146_v26 = vld [vmem:[%s2948_s27 + $0x160] sm:$0xf]  ;;  %v2340_v27 = vld [vmem:[%s2948_s27 + $0x164] sm:$0xf0]  ;;  %v2019_v32 = vor.u32 %v2308_v25, %v2018_v24  ;;  %v2047_v24 = vor.u32 %v2313_v14, %v2044_v15 }
  0x4b   : > { %v2147_v33 = vor.u32 %v2340_v27, %v2146_v26 }
  0x59   : > { %961 = vmatmul.bf16.gmra.mxu0 %v1979_v36  ;;  %1041 = vmatmul.bf16.gmra.mxu2 %v2107_v37  ;;  %v2026_v36 = vld [vmem:[%s2948_s27 + $0x70] sm:$0xf]  ;;  %v2310_v37 = vld [vmem:[%s2948_s27 + $0x74] sm:$0xf0] }
  0x5a   : > { %1130 = vmatmul.bf16.gmra.mxu1 %v1983_v38  ;;  %1210 = vmatmul.bf16.gmra.mxu3 %v2111_v39  ;;  %v2154_v38 = vld [vmem:[%s2948_s27 + $0x170] sm:$0xf]  ;;  %v2342_v39 = vld [vmem:[%s2948_s27 + $0x174] sm:$0xf0]  ;;  %v2027_v44 = vor.u32 %v2310_v37, %v2026_v36 }
  0x5b   : > { %v2155_v45 = vor.u32 %v2342_v39, %v2154_v38 }
  0x69   : > { %966 = vmatmul.bf16.gmra.mxu0 %v1987_v48  ;;  %1046 = vmatmul.bf16.gmra.mxu2 %v2115_v49  ;;  %v2034_v48 = vld [vmem:[%s2948_s27 + $0x80] sm:$0xf]  ;;  %v2312_v49 = vld [vmem:[%s2948_s27 + $0x84] sm:$0xf0] }
  0x6a   : > { %1135 = vmatmul.bf16.gmra.mxu1 %v1991_v50  ;;  %1215 = vmatmul.bf16.gmra.mxu3 %v2119_v51  ;;  %v2162_v50 = vld [vmem:[%s2948_s27 + $0x180] sm:$0xf]  ;;  %v2344_v51 = vld [vmem:[%s2948_s27 + $0x184] sm:$0xf0]  ;;  %v2035_v56 = vor.u32 %v2312_v49, %v2034_v48 }
  0x6b   : > { %v2163_v57 = vor.u32 %v2344_v51, %v2162_v50  ;;  %v2178_v48 = vld [vmem:[%s2948_s27 + $0x1a0] sm:$0xf]  ;;  %v2348_v51 = vld [vmem:[%s2948_s27 + $0x1a4] sm:$0xf0] }
  0x79   : > { %971 = vmatmul.bf16.gmra.mxu0 %v1995_v60  ;;  %1051 = vmatmul.bf16.gmra.mxu2 %v2123_v61  ;;  %v2167_v60 = vor.u32 %v2343_v54, %v2164_v55  ;;  %v2347_v54 = vld [vmem:[%s2948_s27 + $0x1a4] sm:$0xf]  ;;  %v2180_v55 = vld [vmem:[%s2948_s27 + $0x1a8] sm:$0xf0] }
  0x7a   : > { %1140 = vmatmul.bf16.gmra.mxu1 %v1999_v62  ;;  %1220 = vmatmul.bf16.gmra.mxu3 %v2127_v63  ;;  %v3033_v63 = vld [vmem:[%s3291_s2] ss:$0 sm:$0xff] }
  0x89   : > { %976 = vmatmul.bf16.gmra.mxu0 %v2003_v8  ;;  %1056 = vmatmul.bf16.gmra.mxu2 %v2131_v9  ;;  %v2042_v8 = vld [vmem:[%s2948_s27 + $0x90] sm:$0xf]  ;;  %v2314_v9 = vld [vmem:[%s2948_s27 + $0x94] sm:$0xf0] }
  0x8a   : > { %1145 = vmatmul.bf16.gmra.mxu1 %v2007_v10  ;;  %1225 = vmatmul.bf16.gmra.mxu3 %v2135_v11  ;;  %v2170_v10 = vld [vmem:[%s2948_s27 + $0x190] sm:$0xf] }
  0x99   : > { %981 = vmatmul.bf16.gmra.mxu0 %v2011_v20  ;;  %1061 = vmatmul.bf16.gmra.mxu2 %v2139_v21 }
  0x9a   : > { %1150 = vmatmul.bf16.gmra.mxu1 %v2015_v22  ;;  %1230 = vmatmul.bf16.gmra.mxu3 %v2143_v23  ;;  %v2043_v22 = vor.u32 %v2314_v9, %v2042_v8  ;;  %v2171_v23 = vor.u32 %v2346_v13, %v2170_v10 }
  0xa9   : > { %986 = vmatmul.bf16.gmra.mxu0 %v2019_v32  ;;  %1066 = vmatmul.bf16.gmra.mxu2 %v2147_v33 }
  0xaa   : > { %1155 = vmatmul.bf16.gmra.mxu1 %v2023_v34  ;;  %1235 = vmatmul.bf16.gmra.mxu3 %v2151_v35 }
  0xb9   : > { %991 = vmatmul.bf16.gmra.mxu0 %v2027_v44  ;;  %1071 = vmatmul.bf16.gmra.mxu2 %v2155_v45 }
  0xba   : > { %1160 = vmatmul.bf16.gmra.mxu1 %v2031_v46  ;;  %1240 = vmatmul.bf16.gmra.mxu3 %v2159_v47  ;;  %v2050_v46 = vld [vmem:[%s2948_s27 + $0xa0] sm:$0xf]  ;;  %v2316_v47 = vld [vmem:[%s2948_s27 + $0xa4] sm:$0xf0] }
  0xc6   : > { %v957_v58 = vpop.f32.mrf.mxu0 }
  0xc7   : > { %v1126_v61 = vpop.f32.mrf.mxu1 }
  0xc8   : > { %v1127_v62 = vadd.f32 %v1126_v61, %v957_v58  ;;  %v2179_v61 = vor.u32 %v2348_v51, %v2178_v48 }
  0xc9   : > { %996 = vmatmul.bf16.gmra.mxu0 %v2035_v56  ;;  %1076 = vmatmul.bf16.gmra.mxu2 %v2163_v57 }
  0xca   : > { %1165 = vmatmul.bf16.gmra.mxu1 %v2039_v59  ;;  %1245 = vmatmul.bf16.gmra.mxu3 %v2167_v60  ;;  %v1485_v2 = vmul.f32 %v3033_v63, %v1127_v62  ;;  %v2051_v60 = vor.u32 %v2316_v47, %v2050_v46  ;;  %v2055_v62 = vor.u32 %v2315_v52, %v2052_v53 }
  0xcc   : > { %v1037_v0 = vpop.f32.mrf.mxu2  ;;  %v1553_v11 = vadd.f32 %v3039_v3, %v1485_v2 }
  0xcd   : > { %v1206_v1 = vpop.f32.mrf.mxu3 }
  0xce   : > { %v959_v4 = vpop.f32.mrf.mxu0  ;;  %v1207_v6 = vadd.f32 %v1206_v1, %v1037_v0  ;;  %v1617_v25 = vmax.f32 %v1553_v11, 0.0 }
  0xcf   : > { %v1128_v5 = vpop.f32.mrf.mxu1 }
  0xd0   : > { %v1129_v7 = vadd.f32 %v1128_v5, %v959_v4  ;;  %v1517_v18 = vmul.f32 %v3033_v63, %v1207_v6  ;;  %v2183_v5 = vor.u32 %v2347_v54, %v2180_v55 }
  0xd2   : > { %v1486_v12 = vmul.f32 %v3033_v63, %v1129_v7  ;;  %v1585_v31 = vadd.f32 %v3039_v3, %v1517_v18 }
  0xd4   : > { %v1554_v19 = vadd.f32 %v3039_v3, %v1486_v12  ;;  %v1039_v20 = vpop.f32.mrf.mxu2  ;;  %v1649_v36 = vmax.f32 %v1585_v31, 0.0  ;;  %v2188_v31 = vld [vmem:[%s2948_s27 + $0x1b8] sm:$0xf0] }
  0xd5   : > { %v1208_v21 = vpop.f32.mrf.mxu3 }
  0xd6   : > { %v1618_v26 = vmax.f32 %v1554_v19, 0.0  ;;  %v1209_v27 = vadd.f32 %v1208_v21, %v1039_v20  ;;  %v962_v28 = vpop.f32.mrf.mxu0 }
  0xd7   : > { %v1131_v30 = vpop.f32.mrf.mxu1 }
  0xd8   : > { %v2379_v32 = vpack.c.bf16 %v1618_v26, %v1617_v25  ;;  %v1518_v33 = vmul.f32 %v3033_v63, %v1209_v27  ;;  %v1132_v35 = vadd.f32 %v1131_v30, %v962_v28  ;;  %v2350_v27 = vld [vmem:[%s2948_s27 + $0x1b4] sm:$0xf0]  ;;  %v2317_v28 = vld [vmem:[%s2948_s27 + $0xb4] sm:$0xf] }
  0xd9   : > { %1001 = vmatmul.bf16.gmra.mxu0 %v2043_v22  ;;  %1081 = vmatmul.bf16.gmra.mxu2 %v2171_v23  ;;  %v2058_v22 = vld [vmem:[%s2948_s27 + $0xb0] sm:$0xf]  ;;  %v2318_v23 = vld [vmem:[%s2948_s27 + $0xb4] sm:$0xf0]  ;;  %v2349_v30 = vld [vmem:[%s2948_s27 + $0x1b4] sm:$0xf] }
  0xda   : > { %2380 = vst [vmem:[%s3056_s11] sm:$0xff] %v2379_v32   ;;  %v1586_v34 = vadd.f32 %v3039_v3, %v1518_v33  ;;  %1170 = vmatmul.bf16.gmra.mxu1 %v2047_v24  ;;  %1250 = vmatmul.bf16.gmra.mxu3 %v2175_v29  ;;  %v1487_v41 = vmul.f32 %v3033_v63, %v1132_v35  ;;  %v2186_v24 = vld [vmem:[%s2948_s27 + $0x1b0] sm:$0xf]  ;;  %v2060_v29 = vld [vmem:[%s2948_s27 + $0xb8] sm:$0xf0] }
  0xdc   : > { %v1650_v37 = vmax.f32 %v1586_v34, 0.0  ;;  %v1042_v38 = vpop.f32.mrf.mxu2  ;;  %v1555_v49 = vadd.f32 %v3039_v3, %v1487_v41 }
  0xdd   : > { %v1211_v39 = vpop.f32.mrf.mxu3 }
  0xde   : > { %v2459_v40 = vpack.c.bf16 %v1650_v37, %v1649_v36  ;;  %v964_v42 = vpop.f32.mrf.mxu0  ;;  %v1212_v44 = vadd.f32 %v1211_v39, %v1042_v38  ;;  %v1619_v0 = vmax.f32 %v1555_v49, 0.0  ;;  %v2059_v36 = vor.u32 %v2318_v23, %v2058_v22 }
  0xdf   : > { %v1133_v43 = vpop.f32.mrf.mxu1  ;;  %v2187_v37 = vor.u32 %v2350_v27, %v2186_v24  ;;  %v2063_v38 = vor.u32 %v2317_v28, %v2060_v29 }
  0xe0   : > { %2551 = vst [vmem:[%s3056_s11 + $0x80] sm:$0xff] %v2459_v40   ;;  %v1134_v45 = vadd.f32 %v1133_v43, %v964_v42  ;;  %v1519_v56 = vmul.f32 %v3033_v63, %v1212_v44  ;;  %v2191_v43 = vor.u32 %v2349_v30, %v2188_v31 }
  0xe2   : > { %v1488_v50 = vmul.f32 %v3033_v63, %v1134_v45  ;;  %v1587_v7 = vadd.f32 %v3039_v3, %v1519_v56 }
  0xe4   : > { %v1556_v57 = vadd.f32 %v3039_v3, %v1488_v50  ;;  %v1044_v58 = vpop.f32.mrf.mxu2  ;;  %v1651_v12 = vmax.f32 %v1587_v7, 0.0  ;;  %v2196_v7 = vld [vmem:[%s2948_s27 + $0x1c8] sm:$0xf0] }
  0xe5   : > { %v1213_v59 = vpop.f32.mrf.mxu3 }
  0xe6   : > { %v1620_v1 = vmax.f32 %v1556_v57, 0.0  ;;  %v1214_v2 = vadd.f32 %v1213_v59, %v1044_v58  ;;  %v967_v4 = vpop.f32.mrf.mxu0 }
  0xe7   : > { %v1136_v6 = vpop.f32.mrf.mxu1 }
  0xe8   : > { %v2384_v8 = vpack.c.bf16 %v1620_v1, %v1619_v0  ;;  %v1520_v9 = vmul.f32 %v3033_v63, %v1214_v2  ;;  %v1137_v11 = vadd.f32 %v1136_v6, %v967_v4  ;;  %v2352_v2 = vld [vmem:[%s2948_s27 + $0x1c4] sm:$0xf0]  ;;  %v2319_v4 = vld [vmem:[%s2948_s27 + $0xc4] sm:$0xf] }
  0xe9   : > { %1006 = vmatmul.bf16.gmra.mxu0 %v2051_v60  ;;  %1086 = vmatmul.bf16.gmra.mxu2 %v2179_v61  ;;  %v2066_v60 = vld [vmem:[%s2948_s27 + $0xc0] sm:$0xf]  ;;  %v2320_v61 = vld [vmem:[%s2948_s27 + $0xc4] sm:$0xf0]  ;;  %v2351_v6 = vld [vmem:[%s2948_s27 + $0x1c4] sm:$0xf] }
  0xea   : > { %2536 = vst [vmem:[%s3056_s11 + $0x8] sm:$0xff] %v2384_v8   ;;  %v1588_v10 = vadd.f32 %v3039_v3, %v1520_v9  ;;  %1175 = vmatmul.bf16.gmra.mxu1 %v2055_v62  ;;  %1255 = vmatmul.bf16.gmra.mxu3 %v2183_v5  ;;  %v1489_v17 = vmul.f32 %v3033_v63, %v1137_v11  ;;  %v2194_v62 = vld [vmem:[%s2948_s27 + $0x1c0] sm:$0xf]  ;;  %v2068_v5 = vld [vmem:[%s2948_s27 + $0xc8] sm:$0xf0] }
  0xec   : > { %v1652_v13 = vmax.f32 %v1588_v10, 0.0  ;;  %v1047_v14 = vpop.f32.mrf.mxu2  ;;  %v1557_v25 = vadd.f32 %v3039_v3, %v1489_v17 }
  0xed   : > { %v1216_v15 = vpop.f32.mrf.mxu3 }
  0xee   : > { %v2464_v16 = vpack.c.bf16 %v1652_v13, %v1651_v12  ;;  %v969_v18 = vpop.f32.mrf.mxu0  ;;  %v1217_v20 = vadd.f32 %v1216_v15, %v1047_v14  ;;  %v1621_v39 = vmax.f32 %v1557_v25, 0.0  ;;  %v2067_v12 = vor.u32 %v2320_v61, %v2066_v60 }
  0xef   : > { %v1138_v19 = vpop.f32.mrf.mxu1  ;;  %v2195_v13 = vor.u32 %v2352_v2, %v2194_v62  ;;  %v2071_v14 = vor.u32 %v2319_v4, %v2068_v5 }
  0xf0   : > { %2552 = vst [vmem:[%s3056_s11 + $0x88] sm:$0xff] %v2464_v16   ;;  %v1139_v21 = vadd.f32 %v1138_v19, %v969_v18  ;;  %v1521_v32 = vmul.f32 %v3033_v63, %v1217_v20  ;;  %v2199_v19 = vor.u32 %v2351_v6, %v2196_v7 }
  0xf2   : > { %v1490_v26 = vmul.f32 %v3033_v63, %v1139_v21  ;;  %v1589_v45 = vadd.f32 %v3039_v3, %v1521_v32 }
  0xf4   : > { %v1558_v33 = vadd.f32 %v3039_v3, %v1490_v26  ;;  %v1049_v34 = vpop.f32.mrf.mxu2  ;;  %v1653_v50 = vmax.f32 %v1589_v45, 0.0  ;;  %v2204_v45 = vld [vmem:[%s2948_s27 + $0x1d8] sm:$0xf0] }
  0xf5   : > { %v1218_v35 = vpop.f32.mrf.mxu3 }
  0xf6   : > { %v1622_v40 = vmax.f32 %v1558_v33, 0.0  ;;  %v1219_v41 = vadd.f32 %v1218_v35, %v1049_v34  ;;  %v972_v42 = vpop.f32.mrf.mxu0 }
  0xf7   : > { %v1141_v44 = vpop.f32.mrf.mxu1 }
  0xf8   : > { %v2389_v46 = vpack.c.bf16 %v1622_v40, %v1621_v39  ;;  %v1522_v47 = vmul.f32 %v3033_v63, %v1219_v41  ;;  %v1142_v49 = vadd.f32 %v1141_v44, %v972_v42  ;;  %v2354_v41 = vld [vmem:[%s2948_s27 + $0x1d4] sm:$0xf0]  ;;  %v2321_v42 = vld [vmem:[%s2948_s27 + $0xd4] sm:$0xf] }
  0xf9   : > { %1011 = vmatmul.bf16.gmra.mxu0 %v2059_v36  ;;  %1091 = vmatmul.bf16.gmra.mxu2 %v2187_v37  ;;  %v2074_v36 = vld [vmem:[%s2948_s27 + $0xd0] sm:$0xf]  ;;  %v2322_v37 = vld [vmem:[%s2948_s27 + $0xd4] sm:$0xf0]  ;;  %v2353_v44 = vld [vmem:[%s2948_s27 + $0x1d4] sm:$0xf] }
  0xfa   : > { %2537 = vst [vmem:[%s3056_s11 + $0x10] sm:$0xff] %v2389_v46   ;;  %v1590_v48 = vadd.f32 %v3039_v3, %v1522_v47  ;;  %1180 = vmatmul.bf16.gmra.mxu1 %v2063_v38  ;;  %1260 = vmatmul.bf16.gmra.mxu3 %v2191_v43  ;;  %v1491_v55 = vmul.f32 %v3033_v63, %v1142_v49  ;;  %v2202_v38 = vld [vmem:[%s2948_s27 + $0x1d0] sm:$0xf]  ;;  %v2076_v43 = vld [vmem:[%s2948_s27 + $0xd8] sm:$0xf0] }
  0xfc   : > { %v1654_v51 = vmax.f32 %v1590_v48, 0.0  ;;  %v1052_v52 = vpop.f32.mrf.mxu2  ;;  %v1559_v0 = vadd.f32 %v3039_v3, %v1491_v55 }
  0xfd   : > { %v1221_v53 = vpop.f32.mrf.mxu3 }
  0xfe   : > { %v2469_v54 = vpack.c.bf16 %v1654_v51, %v1653_v50  ;;  %v974_v56 = vpop.f32.mrf.mxu0  ;;  %v1222_v58 = vadd.f32 %v1221_v53, %v1052_v52  ;;  %v1623_v15 = vmax.f32 %v1559_v0, 0.0  ;;  %v2075_v50 = vor.u32 %v2322_v37, %v2074_v36 }
  0xff   : > { %v1143_v57 = vpop.f32.mrf.mxu1  ;;  %v2203_v51 = vor.u32 %v2354_v41, %v2202_v38  ;;  %v2079_v52 = vor.u32 %v2321_v42, %v2076_v43 }
 0x100   : > { %2553 = vst [vmem:[%s3056_s11 + $0x90] sm:$0xff] %v2469_v54   ;;  %v1144_v59 = vadd.f32 %v1143_v57, %v974_v56  ;;  %v1523_v8 = vmul.f32 %v3033_v63, %v1222_v58  ;;  %v2207_v57 = vor.u32 %v2353_v44, %v2204_v45 }
 0x102   : > { %v1492_v1 = vmul.f32 %v3033_v63, %v1144_v59  ;;  %v1591_v21 = vadd.f32 %v3039_v3, %v1523_v8 }
 0x104   : > { %v1560_v9 = vadd.f32 %v3039_v3, %v1492_v1  ;;  %v1054_v10 = vpop.f32.mrf.mxu2  ;;  %v1655_v26 = vmax.f32 %v1591_v21, 0.0  ;;  %v2212_v21 = vld [vmem:[%s2948_s27 + $0x1e8] sm:$0xf0] }
 0x105   : > { %v1223_v11 = vpop.f32.mrf.mxu3 }
 0x106   : > { %v1624_v16 = vmax.f32 %v1560_v9, 0.0  ;;  %v1224_v17 = vadd.f32 %v1223_v11, %v1054_v10  ;;  %v977_v18 = vpop.f32.mrf.mxu0 }
 0x107   : > { %v1146_v20 = vpop.f32.mrf.mxu1 }
 0x108   : > { %v2394_v22 = vpack.c.bf16 %v1624_v16, %v1623_v15  ;;  %v1524_v23 = vmul.f32 %v3033_v63, %v1224_v17  ;;  %v1147_v25 = vadd.f32 %v1146_v20, %v977_v18  ;;  %v2356_v17 = vld [vmem:[%s2948_s27 + $0x1e4] sm:$0xf0]  ;;  %v2323_v18 = vld [vmem:[%s2948_s27 + $0xe4] sm:$0xf] }
 0x109   : > { %1016 = vmatmul.bf16.gmra.mxu0 %v2067_v12  ;;  %1096 = vmatmul.bf16.gmra.mxu2 %v2195_v13  ;;  %v2082_v12 = vld [vmem:[%s2948_s27 + $0xe0] sm:$0xf]  ;;  %v2324_v13 = vld [vmem:[%s2948_s27 + $0xe4] sm:$0xf0]  ;;  %v2355_v20 = vld [vmem:[%s2948_s27 + $0x1e4] sm:$0xf] }
 0x10a   : > { %2538 = vst [vmem:[%s3056_s11 + $0x18] sm:$0xff] %v2394_v22   ;;  %v1592_v24 = vadd.f32 %v3039_v3, %v1524_v23  ;;  %1185 = vmatmul.bf16.gmra.mxu1 %v2071_v14  ;;  %1265 = vmatmul.bf16.gmra.mxu3 %v2199_v19  ;;  %v1493_v31 = vmul.f32 %v3033_v63, %v1147_v25  ;;  %v2210_v14 = vld [vmem:[%s2948_s27 + $0x1e0] sm:$0xf]  ;;  %v2084_v19 = vld [vmem:[%s2948_s27 + $0xe8] sm:$0xf0] }
 0x10c   : > { %v1656_v27 = vmax.f32 %v1592_v24, 0.0  ;;  %v1057_v28 = vpop.f32.mrf.mxu2  ;;  %v1561_v39 = vadd.f32 %v3039_v3, %v1493_v31 }
 0x10d   : > { %v1226_v29 = vpop.f32.mrf.mxu3 }
 0x10e   : > { %v2474_v30 = vpack.c.bf16 %v1656_v27, %v1655_v26  ;;  %v979_v32 = vpop.f32.mrf.mxu0  ;;  %v1227_v34 = vadd.f32 %v1226_v29, %v1057_v28  ;;  %v1625_v53 = vmax.f32 %v1561_v39, 0.0  ;;  %v2083_v26 = vor.u32 %v2324_v13, %v2082_v12 }
 0x10f   : > { %v1148_v33 = vpop.f32.mrf.mxu1  ;;  %v2211_v27 = vor.u32 %v2356_v17, %v2210_v14  ;;  %v2087_v28 = vor.u32 %v2323_v18, %v2084_v19 }
 0x110   : > { %2554 = vst [vmem:[%s3056_s11 + $0x98] sm:$0xff] %v2474_v30   ;;  %v1149_v35 = vadd.f32 %v1148_v33, %v979_v32  ;;  %v1525_v46 = vmul.f32 %v3033_v63, %v1227_v34  ;;  %v2215_v33 = vor.u32 %v2355_v20, %v2212_v21 }
 0x112   : > { %v1494_v40 = vmul.f32 %v3033_v63, %v1149_v35  ;;  %v1593_v59 = vadd.f32 %v3039_v3, %v1525_v46 }
 0x114   : > { %v1562_v47 = vadd.f32 %v3039_v3, %v1494_v40  ;;  %v1059_v48 = vpop.f32.mrf.mxu2  ;;  %v1657_v1 = vmax.f32 %v1593_v59, 0.0  ;;  %v2220_v59 = vld [vmem:[%s2948_s27 + $0x1f8] sm:$0xf0] }
 0x115   : > { %v1228_v49 = vpop.f32.mrf.mxu3 }
 0x116   : > { %v1626_v54 = vmax.f32 %v1562_v47, 0.0  ;;  %v1229_v55 = vadd.f32 %v1228_v49, %v1059_v48  ;;  %v982_v56 = vpop.f32.mrf.mxu0 }
 0x117   : > { %v1151_v58 = vpop.f32.mrf.mxu1 }
 0x118   : > { %v2399_v60 = vpack.c.bf16 %v1626_v54, %v1625_v53  ;;  %v1526_v61 = vmul.f32 %v3033_v63, %v1229_v55  ;;  %v1152_v0 = vadd.f32 %v1151_v58, %v982_v56  ;;  %v2358_v55 = vld [vmem:[%s2948_s27 + $0x1f4] sm:$0xf0]  ;;  %v2325_v56 = vld [vmem:[%s2948_s27 + $0xf4] sm:$0xf] }
 0x119   : > { %1021 = vmatmul.bf16.gmra.mxu0 %v2075_v50  ;;  %1101 = vmatmul.bf16.gmra.mxu2 %v2203_v51  ;;  %v2090_v50 = vld [vmem:[%s2948_s27 + $0xf0] sm:$0xf]  ;;  %v2326_v51 = vld [vmem:[%s2948_s27 + $0xf4] sm:$0xf0]  ;;  %v2357_v58 = vld [vmem:[%s2948_s27 + $0x1f4] sm:$0xf] }
 0x11a   : > { %2539 = vst [vmem:[%s3056_s11 + $0x20] sm:$0xff] %v2399_v60   ;;  %v1594_v62 = vadd.f32 %v3039_v3, %v1526_v61  ;;  %1190 = vmatmul.bf16.gmra.mxu1 %v2079_v52  ;;  %1270 = vmatmul.bf16.gmra.mxu3 %v2207_v57  ;;  %v1495_v7 = vmul.f32 %v3033_v63, %v1152_v0  ;;  %v2218_v52 = vld [vmem:[%s2948_s27 + $0x1f0] sm:$0xf]  ;;  %v2092_v57 = vld [vmem:[%s2948_s27 + $0xf8] sm:$0xf0]  ;;  %s2740_s27 = sshra.s32 %s1826_s21, 4  ;;  %s2741_s27 = int_to_ptr.hbm [resolvable:$true] %s2740_s27 }
 0x11b   : > { %s2742_s1 = scalar_lea.hbm %s2741_s27, 256  ;;  %p2747_p9 = scmp.lt.s32.totalorder %s2741_s27, %s3293_s4 }
 0x11c   : > { %v1658_v2 = vmax.f32 %v1594_v62, 0.0  ;;  %v1062_v4 = vpop.f32.mrf.mxu2  ;;  %v1563_v15 = vadd.f32 %v3039_v3, %v1495_v7  ;;  %p2743_p1 = scmp.ne.s32.totalorder %s2741_s27, %s2742_s1  ;;  %p2748_p10 = scmp.lt.s32.totalorder %s2746_s30, %s2742_s1 }
 0x11d   : > { %v1231_v5 = vpop.f32.mrf.mxu3 }
 0x11e   : > { %v2479_v6 = vpack.c.bf16 %v1658_v2, %v1657_v1  ;;  %v984_v8 = vpop.f32.mrf.mxu0  ;;  %v1232_v10 = vadd.f32 %v1231_v5, %v1062_v4  ;;  %v1627_v29 = vmax.f32 %v1563_v15, 0.0  ;;  %v2091_v1 = vor.u32 %v2326_v51, %v2090_v50  ;;  %p2744_p4 = pnand %p2743_p1, %p2924_p3  ;;  %p2749_p11 = por %p2748_p10, %p2747_p9 }
 0x11f   : > { %v1153_v9 = vpop.f32.mrf.mxu1  ;;  %v2219_v2 = vor.u32 %v2358_v55, %v2218_v52  ;;  %v2095_v4 = vor.u32 %v2325_v56, %v2092_v57 }
 0x120   : > { %2555 = vst [vmem:[%s3056_s11 + $0xa0] sm:$0xff] %v2479_v6   ;;  %v1154_v11 = vadd.f32 %v1153_v9, %v984_v8  ;;  %v1527_v22 = vmul.f32 %v3033_v63, %v1232_v10  ;;  %v2223_v9 = vor.u32 %v2357_v58, %v2220_v59  ;;  %p2745_p8 = pneg %p2744_p4 }
 0x122   : > { %v1496_v16 = vmul.f32 %v3033_v63, %v1154_v11  ;;  %v1595_v35 = vadd.f32 %v3039_v3, %v1527_v22  ;;  %p2750_p12 = pnand %p2749_p11, %p2745_p8 }
 0x124   : > { %v1564_v23 = vadd.f32 %v3039_v3, %v1496_v16  ;;  %v1064_v24 = vpop.f32.mrf.mxu2  ;;  %v1659_v40 = vmax.f32 %v1595_v35, 0.0 }
 0x125   : > { %v1233_v25 = vpop.f32.mrf.mxu3 }
 0x126   : > { %v1628_v30 = vmax.f32 %v1564_v23, 0.0  ;;  %v1234_v31 = vadd.f32 %v1233_v25, %v1064_v24  ;;  %v987_v32 = vpop.f32.mrf.mxu0 }
 0x127   : > { %v1156_v34 = vpop.f32.mrf.mxu1 }
 0x128   : > { %v2404_v36 = vpack.c.bf16 %v1628_v30, %v1627_v29  ;;  %v1528_v37 = vmul.f32 %v3033_v63, %v1234_v31  ;;  %v1157_v39 = vadd.f32 %v1156_v34, %v987_v32 }
 0x129   : > { %1026 = vmatmul.bf16.gmra.mxu0 %v2083_v26  ;;  %1106 = vmatmul.bf16.gmra.mxu2 %v2211_v27 }
 0x12a   : > { %2540 = vst [vmem:[%s3056_s11 + $0x28] sm:$0xff] %v2404_v36   ;;  %v1596_v38 = vadd.f32 %v3039_v3, %v1528_v37  ;;  %1195 = vmatmul.bf16.gmra.mxu1 %v2087_v28  ;;  %1275 = vmatmul.bf16.gmra.mxu3 %v2215_v33  ;;  %v1497_v45 = vmul.f32 %v3033_v63, %v1157_v39 }
 0x12c   : > { %v1660_v41 = vmax.f32 %v1596_v38, 0.0  ;;  %v1067_v42 = vpop.f32.mrf.mxu2  ;;  %v1565_v53 = vadd.f32 %v3039_v3, %v1497_v45 }
 0x12d   : > { %v1236_v43 = vpop.f32.mrf.mxu3 }
 0x12e   : > { %v2484_v44 = vpack.c.bf16 %v1660_v41, %v1659_v40  ;;  %v989_v46 = vpop.f32.mrf.mxu0  ;;  %v1237_v48 = vadd.f32 %v1236_v43, %v1067_v42  ;;  %v1629_v5 = vmax.f32 %v1565_v53, 0.0 }
 0x12f   : > { %v1158_v47 = vpop.f32.mrf.mxu1 }
 0x130   : > { %2556 = vst [vmem:[%s3056_s11 + $0xa8] sm:$0xff] %v2484_v44   ;;  %v1159_v49 = vadd.f32 %v1158_v47, %v989_v46  ;;  %v1529_v60 = vmul.f32 %v3033_v63, %v1237_v48 }
 0x132   : > { %v1498_v54 = vmul.f32 %v3033_v63, %v1159_v49  ;;  %v1597_v11 = vadd.f32 %v3039_v3, %v1529_v60 }
 0x134   : > { %v1566_v61 = vadd.f32 %v3039_v3, %v1498_v54  ;;  %v1069_v62 = vpop.f32.mrf.mxu2  ;;  %v1661_v16 = vmax.f32 %v1597_v11, 0.0 }
 0x135   : > { %v1238_v0 = vpop.f32.mrf.mxu3 }
 0x136   : > { %v1630_v6 = vmax.f32 %v1566_v61, 0.0  ;;  %v1239_v7 = vadd.f32 %v1238_v0, %v1069_v62  ;;  %v992_v8 = vpop.f32.mrf.mxu0 }
 0x137   : > { %v1161_v10 = vpop.f32.mrf.mxu1 }
 0x138   : > { %v2409_v12 = vpack.c.bf16 %v1630_v6, %v1629_v5  ;;  %v1530_v13 = vmul.f32 %v3033_v63, %v1239_v7  ;;  %v1162_v15 = vadd.f32 %v1161_v10, %v992_v8 }
 0x139   : > { %1031 = vmatmul.bf16.gmra.mxu0 %v2091_v1  ;;  %1111 = vmatmul.bf16.gmra.mxu2 %v2219_v2 }
 0x13a   : > { %2541 = vst [vmem:[%s3056_s11 + $0x30] sm:$0xff] %v2409_v12   ;;  %v1598_v14 = vadd.f32 %v3039_v3, %v1530_v13  ;;  %1200 = vmatmul.bf16.gmra.mxu1 %v2095_v4  ;;  %1280 = vmatmul.bf16.gmra.mxu3 %v2223_v9  ;;  %v1499_v21 = vmul.f32 %v3033_v63, %v1162_v15 }
 0x13c   : > { %v1662_v17 = vmax.f32 %v1598_v14, 0.0  ;;  %v1072_v18 = vpop.f32.mrf.mxu2  ;;  %v1567_v26 = vadd.f32 %v3039_v3, %v1499_v21 }
 0x13d   : > { %v1241_v19 = vpop.f32.mrf.mxu3 }
 0x13e   : > { %v2489_v20 = vpack.c.bf16 %v1662_v17, %v1661_v16  ;;  %v994_v22 = vpop.f32.mrf.mxu0  ;;  %v1242_v24 = vadd.f32 %v1241_v19, %v1072_v18  ;;  %v1631_v32 = vmax.f32 %v1567_v26, 0.0 }
 0x13f   : > { %v1163_v23 = vpop.f32.mrf.mxu1 }
 0x140   : > { %2557 = vst [vmem:[%s3056_s11 + $0xb0] sm:$0xff] %v2489_v20   ;;  %v1164_v25 = vadd.f32 %v1163_v23, %v994_v22  ;;  %v1531_v28 = vmul.f32 %v3033_v63, %v1242_v24 }
 0x142   : > { %v1500_v27 = vmul.f32 %v3033_v63, %v1164_v25  ;;  %v1599_v37 = vadd.f32 %v3039_v3, %v1531_v28 }
 0x144   : > { %v1568_v29 = vadd.f32 %v3039_v3, %v1500_v27  ;;  %v1074_v30 = vpop.f32.mrf.mxu2  ;;  %v1663_v42 = vmax.f32 %v1599_v37, 0.0 }
 0x145   : > { %v1243_v31 = vpop.f32.mrf.mxu3 }
 0x146   : > { %v1632_v33 = vmax.f32 %v1568_v29, 0.0  ;;  %v1244_v34 = vadd.f32 %v1243_v31, %v1074_v30  ;;  %v997_v35 = vpop.f32.mrf.mxu0 }
 0x147   : > { %v1166_v36 = vpop.f32.mrf.mxu1 }
 0x148   : > { %v2414_v38 = vpack.c.bf16 %v1632_v33, %v1631_v32  ;;  %v1532_v39 = vmul.f32 %v3033_v63, %v1244_v34  ;;  %v1167_v41 = vadd.f32 %v1166_v36, %v997_v35 }
 0x14a   : > { %2542 = vst [vmem:[%s3056_s11 + $0x38] sm:$0xff] %v2414_v38   ;;  %v1600_v40 = vadd.f32 %v3039_v3, %v1532_v39  ;;  %v1501_v47 = vmul.f32 %v3033_v63, %v1167_v41 }
 0x14c   : > { %v1664_v43 = vmax.f32 %v1600_v40, 0.0  ;;  %v1077_v44 = vpop.f32.mrf.mxu2  ;;  %v1569_v52 = vadd.f32 %v3039_v3, %v1501_v47 }
 0x14d   : > { %v1246_v45 = vpop.f32.mrf.mxu3 }
 0x14e   : > { %v2494_v46 = vpack.c.bf16 %v1664_v43, %v1663_v42  ;;  %v999_v48 = vpop.f32.mrf.mxu0  ;;  %v1247_v50 = vadd.f32 %v1246_v45, %v1077_v44  ;;  %v1633_v58 = vmax.f32 %v1569_v52, 0.0 }
 0x14f   : > { %v1168_v49 = vpop.f32.mrf.mxu1 }
 0x150   : > { %2558 = vst [vmem:[%s3056_s11 + $0xb8] sm:$0xff] %v2494_v46   ;;  %v1169_v51 = vadd.f32 %v1168_v49, %v999_v48  ;;  %v1533_v54 = vmul.f32 %v3033_v63, %v1247_v50 }
 0x152   : > { %v1502_v53 = vmul.f32 %v3033_v63, %v1169_v51  ;;  %v1601_v0 = vadd.f32 %v3039_v3, %v1533_v54 }
 0x154   : > { %v1570_v55 = vadd.f32 %v3039_v3, %v1502_v53  ;;  %v1079_v56 = vpop.f32.mrf.mxu2  ;;  %v1665_v6 = vmax.f32 %v1601_v0, 0.0 }
 0x155   : > { %v1248_v57 = vpop.f32.mrf.mxu3 }
 0x156   : > { %v1634_v59 = vmax.f32 %v1570_v55, 0.0  ;;  %v1249_v60 = vadd.f32 %v1248_v57, %v1079_v56  ;;  %v1002_v61 = vpop.f32.mrf.mxu0 }
 0x157   : > { %v1171_v62 = vpop.f32.mrf.mxu1 }
 0x158   : > { %v2419_v1 = vpack.c.bf16 %v1634_v59, %v1633_v58  ;;  %v1534_v2 = vmul.f32 %v3033_v63, %v1249_v60  ;;  %v1172_v5 = vadd.f32 %v1171_v62, %v1002_v61 }
 0x15a   : > { %2543 = vst [vmem:[%s3056_s11 + $0x40] sm:$0xff] %v2419_v1   ;;  %v1602_v4 = vadd.f32 %v3039_v3, %v1534_v2  ;;  %v1503_v11 = vmul.f32 %v3033_v63, %v1172_v5 }
 0x15c   : > { %v1666_v7 = vmax.f32 %v1602_v4, 0.0  ;;  %v1082_v8 = vpop.f32.mrf.mxu2  ;;  %v1571_v16 = vadd.f32 %v3039_v3, %v1503_v11 }
 0x15d   : > { %v1251_v9 = vpop.f32.mrf.mxu3 }
 0x15e   : > { %v2499_v10 = vpack.c.bf16 %v1666_v7, %v1665_v6  ;;  %v1004_v12 = vpop.f32.mrf.mxu0  ;;  %v1252_v14 = vadd.f32 %v1251_v9, %v1082_v8  ;;  %v1635_v22 = vmax.f32 %v1571_v16, 0.0 }
 0x15f   : > { %v1173_v13 = vpop.f32.mrf.mxu1 }
 0x160   : > { %2559 = vst [vmem:[%s3056_s11 + $0xc0] sm:$0xff] %v2499_v10   ;;  %v1174_v15 = vadd.f32 %v1173_v13, %v1004_v12  ;;  %v1535_v18 = vmul.f32 %v3033_v63, %v1252_v14 }
 0x162   : > { %v1504_v17 = vmul.f32 %v3033_v63, %v1174_v15  ;;  %v1603_v27 = vadd.f32 %v3039_v3, %v1535_v18 }
 0x164   : > { %v1572_v19 = vadd.f32 %v3039_v3, %v1504_v17  ;;  %v1084_v20 = vpop.f32.mrf.mxu2  ;;  %v1667_v32 = vmax.f32 %v1603_v27, 0.0 }
 0x165   : > { %v1253_v21 = vpop.f32.mrf.mxu3 }
 0x166   : > { %v1636_v23 = vmax.f32 %v1572_v19, 0.0  ;;  %v1254_v24 = vadd.f32 %v1253_v21, %v1084_v20  ;;  %v1007_v25 = vpop.f32.mrf.mxu0 }
 0x167   : > { %v1176_v26 = vpop.f32.mrf.mxu1 }
 0x168   : > { %v2424_v28 = vpack.c.bf16 %v1636_v23, %v1635_v22  ;;  %v1536_v29 = vmul.f32 %v3033_v63, %v1254_v24  ;;  %v1177_v31 = vadd.f32 %v1176_v26, %v1007_v25 }
 0x16a   : > { %2544 = vst [vmem:[%s3056_s11 + $0x48] sm:$0xff] %v2424_v28   ;;  %v1604_v30 = vadd.f32 %v3039_v3, %v1536_v29  ;;  %v1505_v37 = vmul.f32 %v3033_v63, %v1177_v31 }
 0x16c   : > { %v1668_v33 = vmax.f32 %v1604_v30, 0.0  ;;  %v1087_v34 = vpop.f32.mrf.mxu2  ;;  %v1573_v42 = vadd.f32 %v3039_v3, %v1505_v37 }
 0x16d   : > { %v1256_v35 = vpop.f32.mrf.mxu3 }
 0x16e   : > { %v2504_v36 = vpack.c.bf16 %v1668_v33, %v1667_v32  ;;  %v1009_v38 = vpop.f32.mrf.mxu0  ;;  %v1257_v40 = vadd.f32 %v1256_v35, %v1087_v34  ;;  %v1637_v48 = vmax.f32 %v1573_v42, 0.0 }
 0x16f   : > { %v1178_v39 = vpop.f32.mrf.mxu1 }
 0x170   : > { %2560 = vst [vmem:[%s3056_s11 + $0xc8] sm:$0xff] %v2504_v36   ;;  %v1179_v41 = vadd.f32 %v1178_v39, %v1009_v38  ;;  %v1537_v44 = vmul.f32 %v3033_v63, %v1257_v40 }
 0x172   : > { %v1506_v43 = vmul.f32 %v3033_v63, %v1179_v41  ;;  %v1605_v53 = vadd.f32 %v3039_v3, %v1537_v44 }
 0x174   : > { %v1574_v45 = vadd.f32 %v3039_v3, %v1506_v43  ;;  %v1089_v46 = vpop.f32.mrf.mxu2  ;;  %v1669_v58 = vmax.f32 %v1605_v53, 0.0 }
 0x175   : > { %v1258_v47 = vpop.f32.mrf.mxu3 }
 0x176   : > { %v1638_v49 = vmax.f32 %v1574_v45, 0.0  ;;  %v1259_v50 = vadd.f32 %v1258_v47, %v1089_v46  ;;  %v1012_v51 = vpop.f32.mrf.mxu0 }
 0x177   : > { %v1181_v52 = vpop.f32.mrf.mxu1 }
 0x178   : > { %v2429_v54 = vpack.c.bf16 %v1638_v49, %v1637_v48  ;;  %v1538_v55 = vmul.f32 %v3033_v63, %v1259_v50  ;;  %v1182_v57 = vadd.f32 %v1181_v52, %v1012_v51 }
 0x17a   : > { %2545 = vst [vmem:[%s3056_s11 + $0x50] sm:$0xff] %v2429_v54   ;;  %v1606_v56 = vadd.f32 %v3039_v3, %v1538_v55  ;;  %v1507_v0 = vmul.f32 %v3033_v63, %v1182_v57 }
 0x17c   : > { %v1670_v59 = vmax.f32 %v1606_v56, 0.0  ;;  %v1092_v60 = vpop.f32.mrf.mxu2  ;;  %v1575_v6 = vadd.f32 %v3039_v3, %v1507_v0 }
 0x17d   : > { %v1261_v61 = vpop.f32.mrf.mxu3 }
 0x17e   : > { %v2509_v62 = vpack.c.bf16 %v1670_v59, %v1669_v58  ;;  %v1014_v1 = vpop.f32.mrf.mxu0  ;;  %v1262_v4 = vadd.f32 %v1261_v61, %v1092_v60  ;;  %v1639_v12 = vmax.f32 %v1575_v6, 0.0 }
 0x17f   : > { %v1183_v2 = vpop.f32.mrf.mxu1 }
 0x180   : > { %2561 = vst [vmem:[%s3056_s11 + $0xd0] sm:$0xff] %v2509_v62   ;;  %v1184_v5 = vadd.f32 %v1183_v2, %v1014_v1  ;;  %v1539_v8 = vmul.f32 %v3033_v63, %v1262_v4 }
 0x182   : > { %v1508_v7 = vmul.f32 %v3033_v63, %v1184_v5  ;;  %v1607_v17 = vadd.f32 %v3039_v3, %v1539_v8 }
 0x184   : > { %v1576_v9 = vadd.f32 %v3039_v3, %v1508_v7  ;;  %v1094_v10 = vpop.f32.mrf.mxu2  ;;  %v1671_v22 = vmax.f32 %v1607_v17, 0.0 }
 0x185   : > { %v1263_v11 = vpop.f32.mrf.mxu3 }
 0x186   : > { %v1640_v13 = vmax.f32 %v1576_v9, 0.0  ;;  %v1264_v14 = vadd.f32 %v1263_v11, %v1094_v10  ;;  %v1017_v15 = vpop.f32.mrf.mxu0 }
 0x187   : > { %v1186_v16 = vpop.f32.mrf.mxu1 }
 0x188   : > { %v2434_v18 = vpack.c.bf16 %v1640_v13, %v1639_v12  ;;  %v1540_v19 = vmul.f32 %v3033_v63, %v1264_v14  ;;  %v1187_v21 = vadd.f32 %v1186_v16, %v1017_v15 }
 0x18a   : > { %2546 = vst [vmem:[%s3056_s11 + $0x58] sm:$0xff] %v2434_v18   ;;  %v1608_v20 = vadd.f32 %v3039_v3, %v1540_v19  ;;  %v1509_v27 = vmul.f32 %v3033_v63, %v1187_v21 }
 0x18c   : > { %v1672_v23 = vmax.f32 %v1608_v20, 0.0  ;;  %v1097_v24 = vpop.f32.mrf.mxu2  ;;  %v1577_v32 = vadd.f32 %v3039_v3, %v1509_v27 }
 0x18d   : > { %v1266_v25 = vpop.f32.mrf.mxu3 }
 0x18e   : > { %v2514_v26 = vpack.c.bf16 %v1672_v23, %v1671_v22  ;;  %v1019_v28 = vpop.f32.mrf.mxu0  ;;  %v1267_v30 = vadd.f32 %v1266_v25, %v1097_v24  ;;  %v1641_v38 = vmax.f32 %v1577_v32, 0.0  ;;  %v2664_v23 = vld [vmem:[%s3291_s2] ss:$0 sm:$0xff] }
 0x18f   : > { %v1188_v29 = vpop.f32.mrf.mxu1 }
 0x190   : > { %2562 = vst [vmem:[%s3056_s11 + $0xd8] sm:$0xff] %v2514_v26   ;;  %v1189_v31 = vadd.f32 %v1188_v29, %v1019_v28  ;;  %v1541_v34 = vmul.f32 %v3033_v63, %v1267_v30  ;;  %v2665_v26 = vld [vmem:[%s3292_s3] ss:$0 sm:$0xff] }
 0x192   : > { %v1510_v33 = vmul.f32 %v3033_v63, %v1189_v31  ;;  %v1609_v43 = vadd.f32 %v3039_v3, %v1541_v34 }
 0x194   : > { %v1578_v35 = vadd.f32 %v3039_v3, %v1510_v33  ;;  %v1099_v36 = vpop.f32.mrf.mxu2  ;;  %v1673_v48 = vmax.f32 %v1609_v43, 0.0 }
 0x195   : > { %v1268_v37 = vpop.f32.mrf.mxu3 }
 0x196   : > { %v1642_v39 = vmax.f32 %v1578_v35, 0.0  ;;  %v1269_v40 = vadd.f32 %v1268_v37, %v1099_v36  ;;  %v1022_v41 = vpop.f32.mrf.mxu0 }
 0x197   : > { %v1191_v42 = vpop.f32.mrf.mxu1 }
 0x198   : > { %v2439_v44 = vpack.c.bf16 %v1642_v39, %v1641_v38  ;;  %v1542_v45 = vmul.f32 %v3033_v63, %v1269_v40  ;;  %v1192_v47 = vadd.f32 %v1191_v42, %v1022_v41 }
 0x19a   : > { %2547 = vst [vmem:[%s3056_s11 + $0x60] sm:$0xff] %v2439_v44   ;;  %v1610_v46 = vadd.f32 %v3039_v3, %v1542_v45  ;;  %v1511_v53 = vmul.f32 %v3033_v63, %v1192_v47 }
 0x19c   : > { %v1674_v49 = vmax.f32 %v1610_v46, 0.0  ;;  %v1102_v50 = vpop.f32.mrf.mxu2  ;;  %v1579_v58 = vadd.f32 %v3039_v3, %v1511_v53 }
 0x19d   : > { %v1271_v51 = vpop.f32.mrf.mxu3 }
 0x19e   : > { %v2519_v52 = vpack.c.bf16 %v1674_v49, %v1673_v48  ;;  %v1024_v54 = vpop.f32.mrf.mxu0  ;;  %v1272_v56 = vadd.f32 %v1271_v51, %v1102_v50  ;;  %v1643_v1 = vmax.f32 %v1579_v58, 0.0 }
 0x19f   : > { %v1193_v55 = vpop.f32.mrf.mxu1 }
 0x1a0   : > { %2563 = vst [vmem:[%s3056_s11 + $0xe0] sm:$0xff] %v2519_v52   ;;  %v1194_v57 = vadd.f32 %v1193_v55, %v1024_v54  ;;  %v1543_v60 = vmul.f32 %v3033_v63, %v1272_v56 }
 0x1a2   : > { %v1512_v59 = vmul.f32 %v3033_v63, %v1194_v57  ;;  %v1611_v7 = vadd.f32 %v3039_v3, %v1543_v60 }
 0x1a4   : > { %v1580_v61 = vadd.f32 %v3039_v3, %v1512_v59  ;;  %v1104_v62 = vpop.f32.mrf.mxu2  ;;  %v1675_v12 = vmax.f32 %v1611_v7, 0.0 }
 0x1a5   : > { %v1273_v0 = vpop.f32.mrf.mxu3 }
 0x1a6   : > { %v1644_v2 = vmax.f32 %v1580_v61, 0.0  ;;  %v1274_v4 = vadd.f32 %v1273_v0, %v1104_v62  ;;  %v1027_v5 = vpop.f32.mrf.mxu0 }
 0x1a7   : > { %v1196_v6 = vpop.f32.mrf.mxu1 }
 0x1a8   : > { %v2444_v8 = vpack.c.bf16 %v1644_v2, %v1643_v1  ;;  %v1544_v9 = vmul.f32 %v3033_v63, %v1274_v4  ;;  %v1197_v11 = vadd.f32 %v1196_v6, %v1027_v5 }
 0x1aa   : > { %2548 = vst [vmem:[%s3056_s11 + $0x68] sm:$0xff] %v2444_v8   ;;  %v1612_v10 = vadd.f32 %v3039_v3, %v1544_v9  ;;  %v1513_v17 = vmul.f32 %v3033_v63, %v1197_v11 }
 0x1ac   : > { %v1676_v13 = vmax.f32 %v1612_v10, 0.0  ;;  %v1107_v14 = vpop.f32.mrf.mxu2  ;;  %v1581_v22 = vadd.f32 %v3039_v3, %v1513_v17 }
 0x1ad   : > { %v1276_v15 = vpop.f32.mrf.mxu3 }
 0x1ae   : > { %v2524_v16 = vpack.c.bf16 %v1676_v13, %v1675_v12  ;;  %v1029_v18 = vpop.f32.mrf.mxu0  ;;  %v1277_v20 = vadd.f32 %v1276_v15, %v1107_v14  ;;  %v1645_v29 = vmax.f32 %v1581_v22, 0.0 }
 0x1af   : > { %v1198_v19 = vpop.f32.mrf.mxu1 }
 0x1b0   : > { %2564 = vst [vmem:[%s3056_s11 + $0xe8] sm:$0xff] %v2524_v16   ;;  %v1199_v21 = vadd.f32 %v1198_v19, %v1029_v18  ;;  %v1545_v25 = vmul.f32 %v2664_v23, %v1277_v20 }
 0x1b2   : > { %v1514_v24 = vmul.f32 %v2664_v23, %v1199_v21  ;;  %v1613_v33 = vadd.f32 %v2665_v26, %v1545_v25 }
 0x1b4   : > { %v1582_v27 = vadd.f32 %v2665_v26, %v1514_v24  ;;  %v1109_v63 = vpop.f32.mrf.mxu2  ;;  %v1677_v38 = vmax.f32 %v1613_v33, 0.0 }
 0x1b5   : > { %v1278_v28 = vpop.f32.mrf.mxu3 }
 0x1b6   : > { %v1646_v30 = vmax.f32 %v1582_v27, 0.0  ;;  %v1279_v31 = vadd.f32 %v1278_v28, %v1109_v63  ;;  %v1032_v32 = vpop.f32.mrf.mxu0 }
 0x1b7   : > { %v1201_v3 = vpop.f32.mrf.mxu1 }
 0x1b8   : > { %v2449_v34 = vpack.c.bf16 %v1646_v30, %v1645_v29  ;;  %v1546_v35 = vmul.f32 %v2664_v23, %v1279_v31  ;;  %v1202_v37 = vadd.f32 %v1201_v3, %v1032_v32 }
 0x1ba   : > { %2549 = vst [vmem:[%s3056_s11 + $0x70] sm:$0xff] %v2449_v34   ;;  %v1614_v36 = vadd.f32 %v2665_v26, %v1546_v35  ;;  %v1515_v43 = vmul.f32 %v2664_v23, %v1202_v37 }
 0x1bc   : > { %v1678_v39 = vmax.f32 %v1614_v36, 0.0  ;;  %v1112_v40 = vpop.f32.mrf.mxu2  ;;  %v1583_v48 = vadd.f32 %v2665_v26, %v1515_v43 }
 0x1bd   : > { %v1281_v41 = vpop.f32.mrf.mxu3 }
 0x1be   : > { %v2529_v42 = vpack.c.bf16 %v1678_v39, %v1677_v38  ;;  %v1034_v44 = vpop.f32.mrf.mxu0  ;;  %v1282_v46 = vadd.f32 %v1281_v41, %v1112_v40  ;;  %v1647_v54 = vmax.f32 %v1583_v48, 0.0 }
 0x1bf   : > { %v1203_v45 = vpop.f32.mrf.mxu1 }
 0x1c0   : > { %2565 = vst [vmem:[%s3056_s11 + $0xf0] sm:$0xff] %v2529_v42   ;;  %v1204_v47 = vadd.f32 %v1203_v45, %v1034_v44  ;;  %v1547_v50 = vmul.f32 %v2664_v23, %v1282_v46 }
 0x1c2   : > { %v1516_v49 = vmul.f32 %v2664_v23, %v1204_v47  ;;  %v1615_v57 = vadd.f32 %v2665_v26, %v1547_v50 }
 0x1c4   : > { %v1584_v51 = vadd.f32 %v2665_v26, %v1516_v49  ;;  %v1114_v52 = vpop.f32.mrf.mxu2  ;;  %v1679_v61 = vmax.f32 %v1615_v57, 0.0 }
 0x1c5   : > { %v1283_v53 = vpop.f32.mrf.mxu3 }
 0x1c6   : > { %v1648_v55 = vmax.f32 %v1584_v51, 0.0  ;;  %v1284_v56 = vadd.f32 %v1283_v53, %v1114_v52 }
 0x1c8   : > { %v2454_v58 = vpack.c.bf16 %v1648_v55, %v1647_v54  ;;  %v1548_v59 = vmul.f32 %v2664_v23, %v1284_v56 }
 0x1ca   : > { %2550 = vst [vmem:[%s3056_s11 + $0x78] sm:$0xff] %v2454_v58   ;;  %v1616_v60 = vadd.f32 %v2665_v26, %v1548_v59 }
 0x1cc   : > { %v1680_v62 = vmax.f32 %v1616_v60, 0.0 }
 0x1ce   : > { %v2534_v0 = vpack.c.bf16 %v1680_v62, %v1679_v61 }
 0x1d0   : > { %2566 = vst [vmem:[%s3056_s11 + $0xf8] sm:$0xff] %v2534_v0  }
 0x1d1   : > { %2753 = shalt.err (!%p2750_p12)
}
 0x1d2   : > { %s2819_s10 = smov 64   ;;  %s2820_s11 = smov 4  }
 0x1d3   : > { %2589 = dma.vmem_to_hbm [thread:$0]  (%p2924_p3), %s1824_s13, 4096, %s1826_s21, %s1810_s18, %s2819_s10, %s2819_s10, %s2820_s11  }
 0x1d4 PF: > { %p2606_p13 = scmp.ge.s32.totalorder %s2812_s20, 2  ;;  %s1840_s28 = sand.u32 1, %s2792_s15  }
 0x1d5   : > { %s1841_s29 = scalar_lea.sflag [#allocation5], %s1840_s28 }
 0x1d6   : > { %p2600_p0 = pnand %p2606_p13, %p2895_p6 }
 0x1d8   : > { %p2601_p5 = pneg %p2600_p0 }
 0x1da   : > { %2787 = dma.done.wait (%p2601_p5), %s1841_s29, 4096  }
 0x1db   : > { %2789 = vsyncadd (%p2601_p5), %s1841_s29, 4294963200  ;;  %s21_s20 = sadd.s32 1, %s2812_s20   ;;  %s3305_s12 = sld [smem:[#allocation12_spill]] }
 0x1dc   : > { %p18_p7 = scmp.ge.s32.totalorder %s21_s20, 6   ;;  %s3306_s15 = smov %s2796_s16 }
 0x1dd   : > { %s3307_s16 = smov %s2800_s17  ;;  %s3308_s17 = smov %s2933_s22 }
 0x1de   : > { %s3309_s18 = smov %s2808_s19  ;;  %20 = sbr.rel (!%p18_p7) target bundleno = 9 (0x9), region = 100 }
 0x1e1   : > { %s3310_s19 = smov %s3305_s12 }
 0x1e3   :  { %1847 = vsyncpa [#allocation4], 1 }
 0x1e4   :  { %1849 = vsyncpa [#allocation4 + $0x1], 1 }
 0x1e5   :  { %1850 = vsyncpa [#allocation7], 1 }
 0x1e6   :  { %1851 = vsyncpa [#allocation5], 1 }
 0x1e7   :  { %1853 = vsyncpa [#allocation5 + $0x1], 1 }

</bundles_post_ra>
